<compile_context>
chip_gen: v7x
topology: tpu7x:2x2x1
jax: 0.10.0
libtpu: 0.0.40
codegen_flags: <defaults>
</compile_context>

<pallas_src>
import math

import jax
import jax.numpy as jnp
from jax.experimental import pallas as pl
from jax.experimental.pallas import tpu as pltpu

D = 768        # BERT hidden size (hardcoded in the module)
_TB_MAX = 512  # max batch rows per grid step


def _attn_aggregate_kernel(pooler_ref,    # (S, TB, D)  bf16  pooler output, sentence-major
                           mask_ref,      # (TB, S)     f32   sentence mask
                           posid_ref,     # (TB, S)     i32   sentence_position ids
                           w_comb_ref,    # (D, D)      bf16  W_cur^T @ W_tgt (combined)
                           pos_proj_ref,  # (NP, D)     f32   pos_table @ W_cur
                           w_sp_ref,      # (1, D)      f32   sp_linear.weight (row layout)
                           b_sp_ref,      # (1,)        f32   sp_linear.bias (SMEM)
                           out_ref):      # (TB, 1+S)   f32   col 0 = logit, cols 1..S = weights
    S = pooler_ref.shape[0]
    Dh = pooler_ref.shape[2]
    NP = pos_proj_ref.shape[0]
    inv_sqrt_d = jnp.float32(1.0 / math.sqrt(Dh))
    s_mid = S // 2

    mid = pooler_ref[s_mid]                                   # (TB, D) bf16
    # Single dense MXU matmul per tile (bf16 inputs, f32 accumulation):
    #   cur_w = pooler_mid @ (W_cur^T W_tgt)
    cur_w = jnp.dot(mid, w_comb_ref[...],
                    preferred_element_type=jnp.float32)       # (TB, D) f32

    w_sp = w_sp_ref[...]                                      # (1, D) f32

    # Per sentence slot (S is tiny & static -> unrolled):
    #   raw score  = pooler[s] . cur_w        (VPU mul + XLU lane reduce)
    #   value proj = pooler[s] . w_sp         (sp_linear folded through the attention)
    score_cols = []
    val_cols = []
    for s in range(S):
        p_s = mid if s == s_mid else pooler_ref[s]            # (TB, D) bf16
        score_cols.append(jnp.sum(p_s * cur_w, axis=-1, keepdims=True))   # (TB, 1) f32
        val_cols.append(jnp.sum(p_s * w_sp, axis=-1, keepdims=True))      # (TB, 1) f32
    raw = jnp.concatenate(score_cols, axis=-1)                # (TB, S) f32
    vals = jnp.concatenate(val_cols, axis=-1)                 # (TB, S) f32

    # Positional score: cur_t . pos_table[pos_idx]  ==  pooler_mid . pos_proj[pos_idx],
    # selected via a one-hot compare over the NP (~5) table rows.
    pos_idx = posid_ref[...]                                  # (TB, S) i32
    pos_contrib = jnp.zeros(raw.shape, jnp.float32)
    for p in range(NP):
        row = pos_proj_ref[pl.ds(p, 1), :]                    # (1, D) f32
        psc = jnp.sum(mid * row, axis=-1, keepdims=True)      # (TB, 1) f32
        pos_contrib = pos_contrib + jnp.where(pos_idx == p, psc, jnp.float32(0.0))

    scores = (raw + pos_contrib) * inv_sqrt_d
    mask = mask_ref[...]
    scores = jnp.where(mask == 0.0, jnp.float32(-1e9), scores)

    # masked softmax over the S sentence slots (all f32, exact divide for fidelity)
    m = jnp.max(scores, axis=-1, keepdims=True)
    e = jnp.exp(scores - m)
    w = e / jnp.sum(e, axis=-1, keepdims=True)                # (TB, S)

    # logit = sum_s w[:, s] * (pooler[s] . w_sp) + b   (sp_linear folded, no agg buffer)
    logit = jnp.sum(w * vals, axis=-1, keepdims=True) + b_sp_ref[0]   # (TB, 1)

    out_ref[...] = jnp.concatenate([logit, w], axis=-1)       # single packed writeback


def _round_up(x, m):
    return ((x + m - 1) // m) * m


def _num_tensorcores():
    """Best-effort TensorCores-per-device (2 on v7x, else 1)."""
    try:
        kind = (getattr(jax.devices()[0], "device_kind", "") or "").lower()
        if "v7" in kind or "7x" in kind:
            return 2
    except Exception:
        pass
    return 1


def attn_aggregate_forward_nn(pooler, sentence_mask, sentence_position, params):
    """Pallas-backed forward_nn (post-BERT part). Returns (logits[B,1,1], weight[B,1,S])."""
    B, S, Dh = pooler.shape
    NP = params["pos_table"].shape[0]

    # Batch tile: one fat tile on single-TC chips (v5e/v6e); >= 2 grid steps on
    # 2-TC v7x so both TensorCores get work under dimension_semantics=("parallel",).
    ntc = _num_tensorcores()
    if ntc >= 2 and B >= 32:
        TB = min(_TB_MAX, _round_up(-(-B // ntc), 16))
    else:
        TB = min(_TB_MAX, _round_up(max(B, 1), 16))
    Bp = _round_up(B, TB)
    pad_b = Bp - B

    # Wrapper-side glue (single fused pass over the pooler: pad + transpose + bf16 cast;
    # no f32 up-cast, no position-embedding gather tensor).
    pooler_sbd = jnp.pad(pooler, ((0, pad_b), (0, 0), (0, 0)))
    pooler_sbd = jnp.transpose(pooler_sbd, (1, 0, 2)).astype(jnp.bfloat16)   # (S, Bp, D)

    mask_p = jnp.pad(sentence_mask.astype(jnp.float32), ((0, pad_b), (0, 0)))       # (Bp, S)
    posid_p = jnp.pad(sentence_position.astype(jnp.int32), ((0, pad_b), (0, 0)))    # (Bp, S)

    # One-time tiny XLA precompute (amortized over the whole batch):
    #   W_comb   = W_cur^T @ W_tgt         -> score_main = pooler_mid @ W_comb . pooler[s]
    #   pos_proj = pos_table @ W_cur       -> score_pos  = pooler_mid . pos_proj[pos_idx]
    w_cur_T = params["w_cur_T"].astype(jnp.float32)
    w_tgt_T = params["w_tgt_T"].astype(jnp.float32)
    w_comb = jnp.dot(w_cur_T, w_tgt_T.T).astype(jnp.bfloat16)                 # (D, D)
    pos_proj = jnp.dot(params["pos_table"].astype(jnp.float32), w_cur_T.T)    # (NP, D) f32
    w_sp = params["w_sp_T"].astype(jnp.float32).reshape(1, Dh)                # (1, D)
    b_sp = params["b_sp"].astype(jnp.float32).reshape(1)                      # (1,)

    grid = (Bp // TB,)
    out = pl.pallas_call(
        _attn_aggregate_kernel,
        grid=grid,
        in_specs=[
            pl.BlockSpec((S, TB, Dh), lambda i: (0, i, 0)),   # pooler   -> (S, TB, D)
            pl.BlockSpec((TB, S), lambda i: (i, 0)),          # mask     -> (TB, S)
            pl.BlockSpec((TB, S), lambda i: (i, 0)),          # pos ids  -> (TB, S)
            pl.BlockSpec((Dh, Dh), lambda i: (0, 0)),         # W_comb (grid-invariant)
            pl.BlockSpec((NP, Dh), lambda i: (0, 0)),         # pos_proj (grid-invariant)
            pl.BlockSpec((1, Dh), lambda i: (0, 0)),          # w_sp row (grid-invariant)
            pl.BlockSpec(memory_space=pltpu.MemorySpace.SMEM),  # b_sp scalar
        ],
        out_specs=pl.BlockSpec((TB, 1 + S), lambda i: (i, 0)),
        out_shape=jax.ShapeDtypeStruct((Bp, 1 + S), jnp.float32),
        compiler_params=pltpu.CompilerParams(
            dimension_semantics=("parallel",),
            vmem_limit_bytes=32 * 1024 * 1024),   # working set ~14 MiB at TB=512
    )(pooler_sbd, mask_p, posid_p, w_comb, pos_proj, w_sp, b_sp)

    logits = out[:B, 0].reshape(B, 1, 1)
    weight = out[:B, 1:].reshape(B, 1, S)
    return logits, weight


def attn_aggregate_loss(pooler, sentence_mask, sentence_position, label, params):
    """Mirrors Module.forward: BCEWithLogitsLoss (mean) over the logits."""
    logits, weight = attn_aggregate_forward_nn(pooler, sentence_mask,
                                               sentence_position, params)
    z = logits
    y = label.astype(jnp.float32)
    loss = jnp.mean(jnp.maximum(z, 0.0) - z * y + jnp.log1p(jnp.exp(-jnp.abs(z))))
    return loss, logits, weight


def _reference_forward_nn(pooler, sentence_mask, sentence_position, params):
    """Plain-JAX f32 reference of the ORIGINAL (un-folded) math, for a sanity check."""
    pooler = pooler.astype(jnp.float32)
    B, S, Dh = pooler.shape
    cur = pooler[:, S // 2, :][:, None, :]                                # (B,1,D)
    cur_t = jnp.einsum("bqd,de->bqe", cur, params["w_cur_T"])
    tgt_t = jnp.einsum("bsd,de->bse", pooler, params["w_tgt_T"])
    pos_emb = jnp.take(params["pos_table"], sentence_position, axis=0)    # (B,S,D)
    tgt = tgt_t + pos_emb
    scores = jnp.einsum("bqd,bsd->bqs", cur_t, tgt) / jnp.sqrt(jnp.float32(Dh))
    mask = sentence_mask.astype(jnp.float32)[:, None, :]
    scores = jnp.where(mask == 0.0, -1e9, scores)
    w = jax.nn.softmax(scores, axis=-1)
    agg = jnp.einsum("bqs,bsd->bqd", w, pooler)
    logits = jnp.einsum("bqd,do->bqo", agg, params["w_sp_T"]) + params["b_sp"][0]
    return logits, w


if __name__ == "__main__":
    number_of_sentence = 5     # small, odd -> "current" sentence index = 2
    B, S = 2, number_of_sentence

    key = jax.random.PRNGKey(0)
    k = jax.random.split(key, 8)

    # Deterministic synthetic parameters (shapes from the module __init__).
    params = {
        "w_cur_T": 0.02 * jax.random.normal(k[0], (D, D), jnp.float32),   # Linear(768,768,bias=False).weight.T
        "w_tgt_T": 0.02 * jax.random.normal(k[1], (D, D), jnp.float32),
        "pos_table": 0.02 * jax.random.normal(k[2], (number_of_sentence, D), jnp.float32),
        "w_sp_T": 0.02 * jax.random.normal(k[3], (D, 1), jnp.float32),    # Linear(768,1).weight.T
        "b_sp": 0.1 * jnp.ones((1, 1), jnp.float32),
    }

    # Synthetic "BERT pooler output" and batch fields.
    pooler = jax.random.normal(k[4], (B, S, D), jnp.float32)
    sentence_mask = jnp.array([[1, 1, 1, 1, 0],
                               [1, 1, 1, 1, 1]], jnp.float32)             # (B, S)
    sentence_position = jnp.tile(jnp.arange(S, dtype=jnp.int32), (B, 1))  # (B, S)
    label = (jax.random.uniform(k[5], (B, 1, 1)) > 0.5).astype(jnp.float32)

    loss, logits, weight = attn_aggregate_loss(pooler, sentence_mask,
                                               sentence_position, label, params)
    jax.block_until_ready((loss, logits, weight))

    ref_logits, ref_weight = _reference_forward_nn(pooler, sentence_mask,
                                                   sentence_position, params)
    assert jnp.allclose(logits, ref_logits, rtol=5e-2, atol=5e-2)
    assert jnp.allclose(weight, ref_weight, rtol=5e-2, atol=5e-2)
    assert jnp.isfinite(loss)

    # Second, larger batch to exercise padding and (on v7x) the multi-step grid path,
    # including non-trivial / shuffled sentence positions.
    B2 = 40
    pooler2 = jax.random.normal(k[6], (B2, S, D), jnp.float32)
    mask2 = (jax.random.uniform(k[7], (B2, S)) > 0.2).astype(jnp.float32)
    mask2 = mask2.at[:, S // 2].set(1.0)
    pos2 = jnp.tile(jnp.arange(S, dtype=jnp.int32)[::-1], (B2, 1))
    logits2, weight2 = attn_aggregate_forward_nn(pooler2, mask2, pos2, params)
    jax.block_until_ready((logits2, weight2))
    ref_logits2, ref_weight2 = _reference_forward_nn(pooler2, mask2, pos2, params)
    assert jnp.allclose(logits2, ref_logits2, rtol=5e-2, atol=5e-2)
    assert jnp.allclose(weight2, ref_weight2, rtol=5e-2, atol=5e-2)

    print("KERNEL_OK")
</pallas_src>

<mosaic_0001>
module attributes {stable_mosaic.version = 11 : i64} {
  func.func @_attn_aggregate_kernel(%arg0: i32, %arg1: memref<5x16x768xbf16, #tpu.memory_space<vmem>>, %arg2: memref<16x5xf32, #tpu.memory_space<vmem>>, %arg3: memref<16x5xi32, #tpu.memory_space<vmem>>, %arg4: memref<768x768xbf16, #tpu.memory_space<vmem>>, %arg5: memref<5x768xf32, #tpu.memory_space<vmem>>, %arg6: memref<1x768xf32, #tpu.memory_space<vmem>>, %arg7: memref<1xf32, #tpu.memory_space<smem>>, %arg8: memref<16x6xf32, #tpu.memory_space<vmem>>) attributes {dimension_semantics = [#tpu.dimension_semantics<parallel>], iteration_bounds = array<i64: 1>, scalar_prefetch = 0 : i64, scratch_operands = 0 : i64, tpu.core_type = #tpu.core_type<tc>, window_params = [{transform_indices = @transform_0, window_bounds = array<i64: 5, 16, 768>}, {transform_indices = @transform_1, window_bounds = array<i64: 16, 5>}, {transform_indices = @transform_2, window_bounds = array<i64: 16, 5>}, {pipeline_mode = #tpu.pipeline_mode<synchronous>, transform_indices = @transform_3, window_bounds = array<i64: 768, 768>}, {pipeline_mode = #tpu.pipeline_mode<synchronous>, transform_indices = @transform_4, window_bounds = array<i64: 5, 768>}, {pipeline_mode = #tpu.pipeline_mode<synchronous>, transform_indices = @transform_5, window_bounds = array<i64: 1, 768>}, {transform_indices = @transform_6, window_bounds = array<i64: 1>}, {transform_indices = @transform_7, window_bounds = array<i64: 16, 6>}]} {
    %c2 = arith.constant 2 : index
    %c0 = arith.constant 0 : index
    %c0_0 = arith.constant 0 : index
    %0 = vector.load %arg1[%c2, %c0, %c0_0] : memref<5x16x768xbf16, #tpu.memory_space<vmem>>, vector<1x16x768xbf16>
    %1 = vector.shape_cast %0 : vector<1x16x768xbf16> to vector<16x768xbf16>
    %c0_1 = arith.constant 0 : index
    %c0_2 = arith.constant 0 : index
    %2 = vector.load %arg4[%c0_1, %c0_2] : memref<768x768xbf16, #tpu.memory_space<vmem>>, vector<768x768xbf16>
    %cst = arith.constant dense<0.000000e+00> : vector<16x768xf32>
    %3 = tpu.matmul %1, %2, %cst {dimension_numbers = #tpu.dot_dimension_numbers<[1], [0], [0], [1], [0, 0, 1, 1], [], []>} : vector<16x768xbf16>, vector<768x768xbf16>, vector<16x768xf32> -> vector<16x768xf32>
    %c0_3 = arith.constant 0 : index
    %c0_4 = arith.constant 0 : index
    %4 = vector.load %arg6[%c0_3, %c0_4] : memref<1x768xf32, #tpu.memory_space<vmem>>, vector<1x768xf32>
    %c0_5 = arith.constant 0 : index
    %c0_6 = arith.constant 0 : index
    %c0_7 = arith.constant 0 : index
    %5 = vector.load %arg1[%c0_5, %c0_6, %c0_7] : memref<5x16x768xbf16, #tpu.memory_space<vmem>>, vector<1x16x768xbf16>
    %6 = vector.shape_cast %5 : vector<1x16x768xbf16> to vector<16x768xbf16>
    %7 = arith.extf %6 : vector<16x768xbf16> to vector<16x768xf32>
    %8 = arith.mulf %7, %3 : vector<16x768xf32>
    %cst_8 = arith.constant dense<0.000000e+00> : vector<16xf32>
    %9 = vector.multi_reduction <add>, %8, %cst_8 [1] : vector<16x768xf32> to vector<16xf32>
    %10 = vector.shape_cast %9 : vector<16xf32> to vector<16x1xf32>
    %11 = arith.extf %6 : vector<16x768xbf16> to vector<16x768xf32>
    %12 = vector.broadcast %4 : vector<1x768xf32> to vector<16x768xf32>
    %13 = arith.mulf %11, %12 : vector<16x768xf32>
    %cst_9 = arith.constant dense<0.000000e+00> : vector<16xf32>
    %14 = vector.multi_reduction <add>, %13, %cst_9 [1] : vector<16x768xf32> to vector<16xf32>
    %15 = vector.shape_cast %14 : vector<16xf32> to vector<16x1xf32>
    %c1 = arith.constant 1 : index
    %c0_10 = arith.constant 0 : index
    %c0_11 = arith.constant 0 : index
    %16 = vector.load %arg1[%c1, %c0_10, %c0_11] : memref<5x16x768xbf16, #tpu.memory_space<vmem>>, vector<1x16x768xbf16>
    %17 = vector.shape_cast %16 : vector<1x16x768xbf16> to vector<16x768xbf16>
    %18 = arith.extf %17 : vector<16x768xbf16> to vector<16x768xf32>
    %19 = arith.mulf %18, %3 : vector<16x768xf32>
    %cst_12 = arith.constant dense<0.000000e+00> : vector<16xf32>
    %20 = vector.multi_reduction <add>, %19, %cst_12 [1] : vector<16x768xf32> to vector<16xf32>
    %21 = vector.shape_cast %20 : vector<16xf32> to vector<16x1xf32>
    %22 = arith.extf %17 : vector<16x768xbf16> to vector<16x768xf32>
    %23 = vector.broadcast %4 : vector<1x768xf32> to vector<16x768xf32>
    %24 = arith.mulf %22, %23 : vector<16x768xf32>
    %cst_13 = arith.constant dense<0.000000e+00> : vector<16xf32>
    %25 = vector.multi_reduction <add>, %24, %cst_13 [1] : vector<16x768xf32> to vector<16xf32>
    %26 = vector.shape_cast %25 : vector<16xf32> to vector<16x1xf32>
    %27 = arith.extf %1 : vector<16x768xbf16> to vector<16x768xf32>
    %28 = arith.mulf %27, %3 : vector<16x768xf32>
    %cst_14 = arith.constant dense<0.000000e+00> : vector<16xf32>
    %29 = vector.multi_reduction <add>, %28, %cst_14 [1] : vector<16x768xf32> to vector<16xf32>
    %30 = vector.shape_cast %29 : vector<16xf32> to vector<16x1xf32>
    %31 = arith.extf %1 : vector<16x768xbf16> to vector<16x768xf32>
    %32 = vector.broadcast %4 : vector<1x768xf32> to vector<16x768xf32>
    %33 = arith.mulf %31, %32 : vector<16x768xf32>
    %cst_15 = arith.constant dense<0.000000e+00> : vector<16xf32>
    %34 = vector.multi_reduction <add>, %33, %cst_15 [1] : vector<16x768xf32> to vector<16xf32>
    %35 = vector.shape_cast %34 : vector<16xf32> to vector<16x1xf32>
    %c3 = arith.constant 3 : index
    %c0_16 = arith.constant 0 : index
    %c0_17 = arith.constant 0 : index
    %36 = vector.load %arg1[%c3, %c0_16, %c0_17] : memref<5x16x768xbf16, #tpu.memory_space<vmem>>, vector<1x16x768xbf16>
    %37 = vector.shape_cast %36 : vector<1x16x768xbf16> to vector<16x768xbf16>
    %38 = arith.extf %37 : vector<16x768xbf16> to vector<16x768xf32>
    %39 = arith.mulf %38, %3 : vector<16x768xf32>
    %cst_18 = arith.constant dense<0.000000e+00> : vector<16xf32>
    %40 = vector.multi_reduction <add>, %39, %cst_18 [1] : vector<16x768xf32> to vector<16xf32>
    %41 = vector.shape_cast %40 : vector<16xf32> to vector<16x1xf32>
    %42 = arith.extf %37 : vector<16x768xbf16> to vector<16x768xf32>
    %43 = vector.broadcast %4 : vector<1x768xf32> to vector<16x768xf32>
    %44 = arith.mulf %42, %43 : vector<16x768xf32>
    %cst_19 = arith.constant dense<0.000000e+00> : vector<16xf32>
    %45 = vector.multi_reduction <add>, %44, %cst_19 [1] : vector<16x768xf32> to vector<16xf32>
    %46 = vector.shape_cast %45 : vector<16xf32> to vector<16x1xf32>
    %c4 = arith.constant 4 : index
    %c0_20 = arith.constant 0 : index
    %c0_21 = arith.constant 0 : index
    %47 = vector.load %arg1[%c4, %c0_20, %c0_21] : memref<5x16x768xbf16, #tpu.memory_space<vmem>>, vector<1x16x768xbf16>
    %48 = vector.shape_cast %47 : vector<1x16x768xbf16> to vector<16x768xbf16>
    %49 = arith.extf %48 : vector<16x768xbf16> to vector<16x768xf32>
    %50 = arith.mulf %49, %3 : vector<16x768xf32>
    %cst_22 = arith.constant dense<0.000000e+00> : vector<16xf32>
    %51 = vector.multi_reduction <add>, %50, %cst_22 [1] : vector<16x768xf32> to vector<16xf32>
    %52 = vector.shape_cast %51 : vector<16xf32> to vector<16x1xf32>
    %53 = arith.extf %48 : vector<16x768xbf16> to vector<16x768xf32>
    %54 = vector.broadcast %4 : vector<1x768xf32> to vector<16x768xf32>
    %55 = arith.mulf %53, %54 : vector<16x768xf32>
    %cst_23 = arith.constant dense<0.000000e+00> : vector<16xf32>
    %56 = vector.multi_reduction <add>, %55, %cst_23 [1] : vector<16x768xf32> to vector<16xf32>
    %57 = vector.shape_cast %56 : vector<16xf32> to vector<16x1xf32>
    %58 = tpu.concatenate %10, %21, %30, %41, %52 in 1 : vector<16x1xf32>, vector<16x1xf32>, vector<16x1xf32>, vector<16x1xf32>, vector<16x1xf32> -> vector<16x5xf32>
    %59 = tpu.concatenate %15, %26, %35, %46, %57 in 1 : vector<16x1xf32>, vector<16x1xf32>, vector<16x1xf32>, vector<16x1xf32>, vector<16x1xf32> -> vector<16x5xf32>
    %c0_24 = arith.constant 0 : index
    %c0_25 = arith.constant 0 : index
    %60 = vector.load %arg3[%c0_24, %c0_25] : memref<16x5xi32, #tpu.memory_space<vmem>>, vector<16x5xi32>
    %cst_26 = arith.constant 0.000000e+00 : f32
    %61 = vector.broadcast %cst_26 : f32 to vector<16x5xf32>
    %c0_27 = arith.constant 0 : index
    %c0_28 = arith.constant 0 : index
    %62 = vector.load %arg5[%c0_27, %c0_28] : memref<5x768xf32, #tpu.memory_space<vmem>>, vector<1x768xf32>
    %63 = arith.extf %1 : vector<16x768xbf16> to vector<16x768xf32>
    %64 = vector.broadcast %62 : vector<1x768xf32> to vector<16x768xf32>
    %65 = arith.mulf %63, %64 : vector<16x768xf32>
    %cst_29 = arith.constant dense<0.000000e+00> : vector<16xf32>
    %66 = vector.multi_reduction <add>, %65, %cst_29 [1] : vector<16x768xf32> to vector<16xf32>
    %67 = vector.shape_cast %66 : vector<16xf32> to vector<16x1xf32>
    %c0_i32 = arith.constant 0 : i32
    %68 = vector.broadcast %c0_i32 : i32 to vector<16x5xi32>
    %69 = arith.cmpi eq, %60, %68 : vector<16x5xi32>
    %cst_30 = arith.constant 0.000000e+00 : f32
    %70 = vector.shape_cast %67 : vector<16x1xf32> to vector<16x1xf32>
    %71 = vector.broadcast %70 : vector<16x1xf32> to vector<16x5xf32>
    %72 = vector.broadcast %cst_30 : f32 to vector<16x5xf32>
    %73 = arith.select %69, %71, %72 : vector<16x5xi1>, vector<16x5xf32>
    %74 = arith.addf %61, %73 : vector<16x5xf32>
    %c1_31 = arith.constant 1 : index
    %c0_32 = arith.constant 0 : index
    %75 = vector.load %arg5[%c1_31, %c0_32] : memref<5x768xf32, #tpu.memory_space<vmem>>, vector<1x768xf32>
    %76 = arith.extf %1 : vector<16x768xbf16> to vector<16x768xf32>
    %77 = vector.broadcast %75 : vector<1x768xf32> to vector<16x768xf32>
    %78 = arith.mulf %76, %77 : vector<16x768xf32>
    %cst_33 = arith.constant dense<0.000000e+00> : vector<16xf32>
    %79 = vector.multi_reduction <add>, %78, %cst_33 [1] : vector<16x768xf32> to vector<16xf32>
    %80 = vector.shape_cast %79 : vector<16xf32> to vector<16x1xf32>
    %c1_i32 = arith.constant 1 : i32
    %81 = vector.broadcast %c1_i32 : i32 to vector<16x5xi32>
    %82 = arith.cmpi eq, %60, %81 : vector<16x5xi32>
    %cst_34 = arith.constant 0.000000e+00 : f32
    %83 = vector.shape_cast %80 : vector<16x1xf32> to vector<16x1xf32>
    %84 = vector.broadcast %83 : vector<16x1xf32> to vector<16x5xf32>
    %85 = vector.broadcast %cst_34 : f32 to vector<16x5xf32>
    %86 = arith.select %82, %84, %85 : vector<16x5xi1>, vector<16x5xf32>
    %87 = arith.addf %74, %86 : vector<16x5xf32>
    %c2_35 = arith.constant 2 : index
    %c0_36 = arith.constant 0 : index
    %88 = vector.load %arg5[%c2_35, %c0_36] : memref<5x768xf32, #tpu.memory_space<vmem>>, vector<1x768xf32>
    %89 = arith.extf %1 : vector<16x768xbf16> to vector<16x768xf32>
    %90 = vector.broadcast %88 : vector<1x768xf32> to vector<16x768xf32>
    %91 = arith.mulf %89, %90 : vector<16x768xf32>
    %cst_37 = arith.constant dense<0.000000e+00> : vector<16xf32>
    %92 = vector.multi_reduction <add>, %91, %cst_37 [1] : vector<16x768xf32> to vector<16xf32>
    %93 = vector.shape_cast %92 : vector<16xf32> to vector<16x1xf32>
    %c2_i32 = arith.constant 2 : i32
    %94 = vector.broadcast %c2_i32 : i32 to vector<16x5xi32>
    %95 = arith.cmpi eq, %60, %94 : vector<16x5xi32>
    %cst_38 = arith.constant 0.000000e+00 : f32
    %96 = vector.shape_cast %93 : vector<16x1xf32> to vector<16x1xf32>
    %97 = vector.broadcast %96 : vector<16x1xf32> to vector<16x5xf32>
    %98 = vector.broadcast %cst_38 : f32 to vector<16x5xf32>
    %99 = arith.select %95, %97, %98 : vector<16x5xi1>, vector<16x5xf32>
    %100 = arith.addf %87, %99 : vector<16x5xf32>
    %c3_39 = arith.constant 3 : index
    %c0_40 = arith.constant 0 : index
    %101 = vector.load %arg5[%c3_39, %c0_40] : memref<5x768xf32, #tpu.memory_space<vmem>>, vector<1x768xf32>
    %102 = arith.extf %1 : vector<16x768xbf16> to vector<16x768xf32>
    %103 = vector.broadcast %101 : vector<1x768xf32> to vector<16x768xf32>
    %104 = arith.mulf %102, %103 : vector<16x768xf32>
    %cst_41 = arith.constant dense<0.000000e+00> : vector<16xf32>
    %105 = vector.multi_reduction <add>, %104, %cst_41 [1] : vector<16x768xf32> to vector<16xf32>
    %106 = vector.shape_cast %105 : vector<16xf32> to vector<16x1xf32>
    %c3_i32 = arith.constant 3 : i32
    %107 = vector.broadcast %c3_i32 : i32 to vector<16x5xi32>
    %108 = arith.cmpi eq, %60, %107 : vector<16x5xi32>
    %cst_42 = arith.constant 0.000000e+00 : f32
    %109 = vector.shape_cast %106 : vector<16x1xf32> to vector<16x1xf32>
    %110 = vector.broadcast %109 : vector<16x1xf32> to vector<16x5xf32>
    %111 = vector.broadcast %cst_42 : f32 to vector<16x5xf32>
    %112 = arith.select %108, %110, %111 : vector<16x5xi1>, vector<16x5xf32>
    %113 = arith.addf %100, %112 : vector<16x5xf32>
    %c4_43 = arith.constant 4 : index
    %c0_44 = arith.constant 0 : index
    %114 = vector.load %arg5[%c4_43, %c0_44] : memref<5x768xf32, #tpu.memory_space<vmem>>, vector<1x768xf32>
    %115 = arith.extf %1 : vector<16x768xbf16> to vector<16x768xf32>
    %116 = vector.broadcast %114 : vector<1x768xf32> to vector<16x768xf32>
    %117 = arith.mulf %115, %116 : vector<16x768xf32>
    %cst_45 = arith.constant dense<0.000000e+00> : vector<16xf32>
    %118 = vector.multi_reduction <add>, %117, %cst_45 [1] : vector<16x768xf32> to vector<16xf32>
    %119 = vector.shape_cast %118 : vector<16xf32> to vector<16x1xf32>
    %c4_i32 = arith.constant 4 : i32
    %120 = vector.broadcast %c4_i32 : i32 to vector<16x5xi32>
    %121 = arith.cmpi eq, %60, %120 : vector<16x5xi32>
    %cst_46 = arith.constant 0.000000e+00 : f32
    %122 = vector.shape_cast %119 : vector<16x1xf32> to vector<16x1xf32>
    %123 = vector.broadcast %122 : vector<16x1xf32> to vector<16x5xf32>
    %124 = vector.broadcast %cst_46 : f32 to vector<16x5xf32>
    %125 = arith.select %121, %123, %124 : vector<16x5xi1>, vector<16x5xf32>
    %126 = arith.addf %113, %125 : vector<16x5xf32>
    %127 = arith.addf %58, %126 : vector<16x5xf32>
    %cst_47 = arith.constant 0.0360843912 : f32
    %128 = vector.broadcast %cst_47 : f32 to vector<16x5xf32>
    %129 = arith.mulf %127, %128 : vector<16x5xf32>
    %c0_48 = arith.constant 0 : index
    %c0_49 = arith.constant 0 : index
    %130 = vector.load %arg2[%c0_48, %c0_49] : memref<16x5xf32, #tpu.memory_space<vmem>>, vector<16x5xf32>
    %cst_50 = arith.constant 0.000000e+00 : f32
    %131 = vector.broadcast %cst_50 : f32 to vector<16x5xf32>
    %132 = arith.cmpf oeq, %130, %131 : vector<16x5xf32>
    %cst_51 = arith.constant -1.000000e+09 : f32
    %133 = vector.broadcast %cst_51 : f32 to vector<16x5xf32>
    %134 = arith.select %132, %133, %129 : vector<16x5xi1>, vector<16x5xf32>
    %cst_52 = arith.constant dense<0xFF800000> : vector<16xf32>
    %135 = vector.multi_reduction <maximumf>, %134, %cst_52 [1] : vector<16x5xf32> to vector<16xf32>
    %136 = vector.shape_cast %135 : vector<16xf32> to vector<16x1xf32>
    %137 = vector.broadcast %136 : vector<16x1xf32> to vector<16x5xf32>
    %138 = arith.subf %134, %137 : vector<16x5xf32>
    %139 = math.exp %138 : vector<16x5xf32>
    %cst_53 = arith.constant dense<0.000000e+00> : vector<16xf32>
    %140 = vector.multi_reduction <add>, %139, %cst_53 [1] : vector<16x5xf32> to vector<16xf32>
    %141 = vector.shape_cast %140 : vector<16xf32> to vector<16x1xf32>
    %142 = vector.broadcast %141 : vector<16x1xf32> to vector<16x5xf32>
    %143 = arith.divf %139, %142 : vector<16x5xf32>
    %144 = arith.mulf %143, %59 : vector<16x5xf32>
    %cst_54 = arith.constant dense<0.000000e+00> : vector<16xf32>
    %145 = vector.multi_reduction <add>, %144, %cst_54 [1] : vector<16x5xf32> to vector<16xf32>
    %146 = vector.shape_cast %145 : vector<16xf32> to vector<16x1xf32>
    %c0_55 = arith.constant 0 : index
    %147 = memref.load %arg7[%c0_55] : memref<1xf32, #tpu.memory_space<smem>>
    %148 = vector.broadcast %147 : f32 to vector<16x1xf32>
    %149 = arith.addf %146, %148 : vector<16x1xf32>
    %150 = tpu.concatenate %149, %143 in 1 : vector<16x1xf32>, vector<16x5xf32> -> vector<16x6xf32>
    %c0_56 = arith.constant 0 : index
    %c0_57 = arith.constant 0 : index
    %151 = vector.load %arg8[%c0_56, %c0_57] : memref<16x6xf32, #tpu.memory_space<vmem>>, vector<16x6xf32>
    tpu.vector_store %arg8[%c0_56, %c0_57], %150 {strides = array<i32>} : memref<16x6xf32, #tpu.memory_space<vmem>>, vector<16x6xf32>,
    return
  }
  func.func @transform_0(%arg0: i32) -> (i32, i32, i32) {
    %c0_i32 = arith.constant 0 : i32
    %c0_i32_0 = arith.constant 0 : i32
    %c0_i32_1 = arith.constant 0 : i32
    return %c0_i32, %arg0, %c0_i32_0 : i32, i32, i32
  }
  func.func @transform_1(%arg0: i32) -> (i32, i32) {
    %c0_i32 = arith.constant 0 : i32
    %c0_i32_0 = arith.constant 0 : i32
    return %arg0, %c0_i32 : i32, i32
  }
  func.func @transform_2(%arg0: i32) -> (i32, i32) {
    %c0_i32 = arith.constant 0 : i32
    %c0_i32_0 = arith.constant 0 : i32
    return %arg0, %c0_i32 : i32, i32
  }
  func.func @transform_3(%arg0: i32) -> (i32, i32) {
    %c0_i32 = arith.constant 0 : i32
    %c0_i32_0 = arith.constant 0 : i32
    %c0_i32_1 = arith.constant 0 : i32
    return %c0_i32, %c0_i32_0 : i32, i32
  }
  func.func @transform_4(%arg0: i32) -> (i32, i32) {
    %c0_i32 = arith.constant 0 : i32
    %c0_i32_0 = arith.constant 0 : i32
    %c0_i32_1 = arith.constant 0 : i32
    return %c0_i32, %c0_i32_0 : i32, i32
  }
  func.func @transform_5(%arg0: i32) -> (i32, i32) {
    %c0_i32 = arith.constant 0 : i32
    %c0_i32_0 = arith.constant 0 : i32
    %c0_i32_1 = arith.constant 0 : i32
    return %c0_i32, %c0_i32_0 : i32, i32
  }
  func.func @transform_6(%arg0: i32) -> i32 {
    %c0_i32 = arith.constant 0 : i32
    %c0_i32_0 = arith.constant 0 : i32
    return %c0_i32 : i32
  }
  func.func @transform_7(%arg0: i32) -> (i32, i32) {
    %c0_i32 = arith.constant 0 : i32
    %c0_i32_0 = arith.constant 0 : i32
    return %arg0, %c0_i32 : i32, i32
  }
}

</mosaic_0001>

<bundles_post_ra>
// kernel: tpu_custom_call.1
= control target key start
LH: loop header
LB: loop body
LE: loop exit
PB: predicated region body
PF: predicated region fallthrough
CT: control target
= control target key end

     0   :  { %13 = vsyncpa [#allocation4], 0  ;;  %s4689_s0 = inlined_call_operand.hbm [shape: bf16[5,16,768], index: 0, kind: input, shape index: {}]   ;;  %s4690_s1 = inlined_call_operand.vmem [shape: f32[16,5], index: 1, kind: input, shape index: {}]   ;;  %s4691_s2 = inlined_call_operand.vmem [shape: s32[16,5], index: 2, kind: input, shape index: {}]   ;;  %s4692_s3 = inlined_call_operand.hbm [shape: bf16[768,768], index: 3, kind: input, shape index: {}]   ;;  %s4693_s4 = inlined_call_operand.hbm [shape: f32[5,768], index: 4, kind: input, shape index: {}]   ;;  %s4694_s5 = inlined_call_operand.hbm [shape: f32[1,768], index: 5, kind: input, shape index: {}]   ;;  %s4695_s6 = inlined_call_operand.<no memory space> [shape: f32[1], index: 6, kind: input, shape index: {}]   ;;  %s4696_s7 = inlined_call_operand.vmem [shape: f32[16,6], index: 7, kind: output, shape index: {}]  }
   0x1   :  { %14 = vsyncpa [#allocation6], 0 }
   0x2   :  { %15 = vsyncpa [#allocation9], 0  ;;  %s3901_s24 = smov [#allocation5]   ;;  %s3902_s26 = smov [#allocation3]  }
   0x3   :  { %s37_s25 = sshll.u32 %s3901_s24, 4  ;;  %s21_s27 = sshll.u32 %s3902_s26, 4  ;;  %s38_s25 = int_to_ptr.vmem [resolvable:$true] %s37_s25  ;;  %s3948_s27 = int_to_ptr.vmem [resolvable:$true] %s21_s27 }
   0x4   :  { %s3807_s30 = scalar_lea.hbm %s4692_s3, 36864 }
   0x5   :  { %p3808_p0 = scmp.ne.s32.totalorder %s4692_s3, %s3807_s30  ;;  %p3811_p1 = scmp.lt.u32.totalorder %s3807_s30, %s4692_s3 }
   0x7   :  { %p3813_p2 = pnand %p3811_p1, %p3808_p0 }
   0x9   :  { %3816 = shalt.err (!%p3813_p2)
}
   0xa   :  { %s3817_s12 = scalar_lea.vmem %s38_s25, 36864  ;;  %p3822_p4 = scmp.lt.s32.totalorder %s38_s25, %s38_s25 }
   0xb   :  { %p3818_p3 = scmp.ne.s32.totalorder %s38_s25, %s3817_s12  ;;  %p3823_p5 = scmp.lt.s32.totalorder %s3817_s12, %s3817_s12 }
   0xd   :  { %p3824_p6 = por %p3823_p5, %p3822_p4 }
   0xf   :  { %p3825_p7 = pnand %p3824_p6, %p3818_p3 }
  0x11   :  { %3828 = shalt.err (!%p3825_p7)
}
  0x12   :  { %s3903_s13 = smov 384   ;;  %s3904_s14 = smov 24  }
  0x13   :  { %43 = dma.hbm_to_vmem [thread:$0]  %s4692_s3, 36864, %s38_s25, [#allocation6], %s3903_s13, %s3903_s13, %s3904_s14  }
  0x14   :  { %s3829_s19 = scalar_lea.hbm %s4689_s0, 3840 }
  0x15   :  { %p3830_p8 = scmp.ne.s32.totalorder %s4689_s0, %s3829_s19  ;;  %p3833_p9 = scmp.lt.u32.totalorder %s3829_s19, %s4689_s0 }
  0x17   :  { %p3835_p10 = pnand %p3833_p9, %p3830_p8 }
  0x19   :  { %3838 = shalt.err (!%p3835_p10)
}
  0x1a   :  { %s3839_s24 = scalar_lea.vmem %s3948_s27, 3840  ;;  %p3844_p12 = scmp.lt.s32.totalorder %s3948_s27, %s3948_s27 }
  0x1b   :  { %p3840_p11 = scmp.ne.s32.totalorder %s3948_s27, %s3839_s24  ;;  %p3845_p13 = scmp.lt.s32.totalorder %s3839_s24, %s3839_s24 }
  0x1d   :  { %p3846_p0 = por %p3845_p13, %p3844_p12 }
  0x1f   :  { %p3847_p1 = pnand %p3846_p0, %p3840_p11 }
  0x21   :  { %3850 = shalt.err (!%p3847_p1)
}
  0x22   :  { %27 = dma.hbm_to_vmem [thread:$0]  %s4689_s0, 3840, %s3948_s27, [#allocation4], %s3903_s13, %s3903_s13, %s3904_s14  }
  0x23   :  { %s3905_s26 = smov [#allocation7]   ;;  %s3906_s29 = smov [#allocation8]  }
  0x24   :  { %s50_s28 = sshll.u32 %s3905_s26, 4  ;;  %s60_s30 = sshll.u32 %s3906_s29, 4  ;;  %s51_s28 = int_to_ptr.vmem [resolvable:$true] %s50_s28  ;;  %s61_s30 = int_to_ptr.vmem [resolvable:$true] %s60_s30 }
  0x25   :  { %s3851_s10 = scalar_lea.hbm %s4693_s4, 768 }
  0x26   :  { %p3852_p2 = scmp.ne.s32.totalorder %s4693_s4, %s3851_s10  ;;  %p3855_p3 = scmp.lt.u32.totalorder %s3851_s10, %s4693_s4 }
  0x28   :  { %p3857_p4 = pnand %p3855_p3, %p3852_p2 }
  0x2a   :  { %3860 = shalt.err (!%p3857_p4)
}
  0x2b   :  { %s3861_s0 = scalar_lea.vmem %s51_s28, 768  ;;  %p3866_p6 = scmp.lt.s32.totalorder %s51_s28, %s51_s28 }
  0x2c   :  { %p3862_p5 = scmp.ne.s32.totalorder %s51_s28, %s3861_s0  ;;  %p3867_p7 = scmp.lt.s32.totalorder %s3861_s0, %s3861_s0 }
  0x2e   :  { %p3868_p8 = por %p3867_p7, %p3866_p6 }
  0x30   :  { %p3869_p9 = pnand %p3868_p8, %p3862_p5 }
  0x32   :  { %3872 = shalt.err (!%p3869_p9)
}
  0x33   :  { %53 = dma.hbm_to_vmem [thread:$0]  %s4693_s4, 768, %s51_s28, [#allocation6]  }
  0x34   :  { %s3873_s18 = scalar_lea.hbm %s4694_s5, 96 }
  0x35   :  { %p3874_p10 = scmp.ne.s32.totalorder %s4694_s5, %s3873_s18  ;;  %p3877_p11 = scmp.lt.u32.totalorder %s3873_s18, %s4694_s5 }
  0x37   :  { %p3879_p12 = pnand %p3877_p11, %p3874_p10 }
  0x39   :  { %3882 = shalt.err (!%p3879_p12)
}
  0x3a   :  { %s3883_s23 = scalar_lea.vmem %s61_s30, 96  ;;  %p3888_p0 = scmp.lt.s32.totalorder %s61_s30, %s61_s30 }
  0x3b   :  { %p3884_p13 = scmp.ne.s32.totalorder %s61_s30, %s3883_s23  ;;  %p3889_p1 = scmp.lt.s32.totalorder %s3883_s23, %s3883_s23 }
  0x3d   :  { %p3890_p2 = por %p3889_p1, %p3888_p0 }
  0x3f   :  { %p3891_p3 = pnand %p3890_p2, %p3884_p13 }
  0x41   :  { %3894 = shalt.err (!%p3891_p3)
}
  0x42   :  { %63 = dma.hbm_to_vmem [thread:$0]  %s4694_s5, 96, %s61_s30, [#allocation9]  }
  0x43   :  { %3895 = dma.done.wait [#allocation4], 3840  }
  0x44   :  { %3896 = vsyncadd [#allocation4], 4294963456 }
  0x45   :  { %3897 = dma.done.wait [#allocation6], 37632  }
  0x46   :  { %3898 = vsyncadd [#allocation6], 4294929664 }
  0x47   :  { %3899 = dma.done.wait [#allocation9], 96  }
  0x48   :  { %3900 = vsyncadd [#allocation9], 4294967200  ;;  %v3355_v0 = vld [vmem:[#allocation5 + $0x4] ss:$24 sps:$4 sm:$0xff]   ;;  %v3359_v2 = vld [vmem:[#allocation5] ss:$24 sps:$4 sm:$0xff]  }
  0x49   :  { %v3357_v1 = vld [vmem:[#allocation5 + $0x304] ss:$24 sps:$4 sm:$0xff]   ;;  %1843 = vmatprep.subr.bf16.mxu1 %v3355_v0  ;;  %v3360_v3 = vld [vmem:[#allocation5 + $0x300] ss:$24 sps:$4 sm:$0xff]   ;;  %v3361_v4 = vld [vmem:[#allocation5 + $0x34] ss:$24 sps:$4 sm:$0xff]  }
  0x4a   :  { %1886 = vmatprep.subr.bf16.mxu0 %v3357_v1  ;;  %1844 = vmatpush1.bf16.msra.mxu1 %v3359_v2  ;;  %v3363_v5 = vld [vmem:[#allocation5 + $0x334] ss:$24 sps:$4 sm:$0xff]   ;;  %v3365_v6 = vld [vmem:[#allocation5 + $0x30] ss:$24 sps:$4 sm:$0xff]   ;;  %v3367_v8 = vld [vmem:[#allocation5 + $0x64] ss:$24 sps:$4 sm:$0xff]  }
  0x4b   :  { %1887 = vmatpush1.bf16.msra.mxu0 %v3360_v3  ;;  %1845 = vmatprep.subr.bf16.mxu1 %v3361_v4  ;;  %v3366_v7 = vld [vmem:[#allocation5 + $0x330] ss:$24 sps:$4 sm:$0xff]   ;;  %v3369_v9 = vld [vmem:[#allocation5 + $0x364] ss:$24 sps:$4 sm:$0xff]   ;;  %v3371_v10 = vld [vmem:[#allocation5 + $0x60] ss:$24 sps:$4 sm:$0xff]  }
  0x4c   :  { %1888 = vmatprep.subr.bf16.mxu0 %v3363_v5  ;;  %v3372_v11 = vld [vmem:[#allocation5 + $0x360] ss:$24 sps:$4 sm:$0xff]   ;;  %v3373_v12 = vld [vmem:[#allocation5 + $0x94] ss:$24 sps:$4 sm:$0xff]   ;;  %v3377_v14 = vld [vmem:[#allocation5 + $0x90] ss:$24 sps:$4 sm:$0xff]  }
  0x4d   :  { %v3375_v13 = vld [vmem:[#allocation5 + $0x394] ss:$24 sps:$4 sm:$0xff]   ;;  %v3378_v15 = vld [vmem:[#allocation5 + $0x390] ss:$24 sps:$4 sm:$0xff]   ;;  %v3379_v16 = vld [vmem:[#allocation5 + $0xc4] ss:$24 sps:$4 sm:$0xff]  }
  0x4e   :  { %1846 = vmatpush1.bf16.msra.mxu1 %v3365_v6  ;;  %v3381_v17 = vld [vmem:[#allocation5 + $0x3c4] ss:$24 sps:$4 sm:$0xff]   ;;  %v3383_v18 = vld [vmem:[#allocation5 + $0xc0] ss:$24 sps:$4 sm:$0xff]   ;;  %v3385_v20 = vld [vmem:[#allocation5 + $0xf4] ss:$24 sps:$4 sm:$0xff]  }
  0x4f   :  { %1889 = vmatpush1.bf16.msra.mxu0 %v3366_v7  ;;  %1847 = vmatprep.subr.bf16.mxu1 %v3367_v8  ;;  %v3384_v19 = vld [vmem:[#allocation5 + $0x3c0] ss:$24 sps:$4 sm:$0xff]   ;;  %v3387_v21 = vld [vmem:[#allocation5 + $0x3f4] ss:$24 sps:$4 sm:$0xff]   ;;  %v3389_v22 = vld [vmem:[#allocation5 + $0xf0] ss:$24 sps:$4 sm:$0xff]  }
  0x50   :  { %1890 = vmatprep.subr.bf16.mxu0 %v3369_v9  ;;  %v3390_v23 = vld [vmem:[#allocation5 + $0x3f0] ss:$24 sps:$4 sm:$0xff]   ;;  %v3391_v24 = vld [vmem:[#allocation5 + $0x124] ss:$24 sps:$4 sm:$0xff]   ;;  %v3395_v26 = vld [vmem:[#allocation5 + $0x120] ss:$24 sps:$4 sm:$0xff]  }
  0x51   :  { %v3393_v25 = vld [vmem:[#allocation5 + $0x424] ss:$24 sps:$4 sm:$0xff]   ;;  %v3396_v27 = vld [vmem:[#allocation5 + $0x420] ss:$24 sps:$4 sm:$0xff]   ;;  %v3397_v28 = vld [vmem:[#allocation5 + $0x154] ss:$24 sps:$4 sm:$0xff]  }
  0x52   :  { %1848 = vmatpush1.bf16.msra.mxu1 %v3371_v10  ;;  %v3399_v29 = vld [vmem:[#allocation5 + $0x454] ss:$24 sps:$4 sm:$0xff]   ;;  %v3401_v30 = vld [vmem:[#allocation5 + $0x150] ss:$24 sps:$4 sm:$0xff]   ;;  %v3403_v32 = vld [vmem:[#allocation5 + $0x184] ss:$24 sps:$4 sm:$0xff]  }
  0x53   :  { %1891 = vmatpush1.bf16.msra.mxu0 %v3372_v11  ;;  %1849 = vmatprep.subr.bf16.mxu1 %v3373_v12  ;;  %v3402_v31 = vld [vmem:[#allocation5 + $0x450] ss:$24 sps:$4 sm:$0xff]   ;;  %v3405_v33 = vld [vmem:[#allocation5 + $0x484] ss:$24 sps:$4 sm:$0xff]   ;;  %v3407_v34 = vld [vmem:[#allocation5 + $0x180] ss:$24 sps:$4 sm:$0xff]  }
  0x54   :  { %1892 = vmatprep.subr.bf16.mxu0 %v3375_v13  ;;  %v3408_v35 = vld [vmem:[#allocation5 + $0x480] ss:$24 sps:$4 sm:$0xff]   ;;  %v3409_v36 = vld [vmem:[#allocation5 + $0x1b4] ss:$24 sps:$4 sm:$0xff]   ;;  %v3413_v38 = vld [vmem:[#allocation5 + $0x1b0] ss:$24 sps:$4 sm:$0xff]  }
  0x55   :  { %v3411_v37 = vld [vmem:[#allocation5 + $0x4b4] ss:$24 sps:$4 sm:$0xff]   ;;  %v3414_v39 = vld [vmem:[#allocation5 + $0x4b0] ss:$24 sps:$4 sm:$0xff]   ;;  %v3415_v40 = vld [vmem:[#allocation5 + $0x1e4] ss:$24 sps:$4 sm:$0xff]  }
  0x56   :  { %1850 = vmatpush1.bf16.msra.mxu1 %v3377_v14  ;;  %v3417_v41 = vld [vmem:[#allocation5 + $0x4e4] ss:$24 sps:$4 sm:$0xff]   ;;  %v3419_v42 = vld [vmem:[#allocation5 + $0x1e0] ss:$24 sps:$4 sm:$0xff]   ;;  %v3421_v44 = vld [vmem:[#allocation5 + $0x214] ss:$24 sps:$4 sm:$0xff]  }
  0x57   :  { %1893 = vmatpush1.bf16.msra.mxu0 %v3378_v15  ;;  %1851 = vmatprep.subr.bf16.mxu1 %v3379_v16  ;;  %v3420_v43 = vld [vmem:[#allocation5 + $0x4e0] ss:$24 sps:$4 sm:$0xff]   ;;  %v3423_v45 = vld [vmem:[#allocation5 + $0x514] ss:$24 sps:$4 sm:$0xff]   ;;  %v3425_v46 = vld [vmem:[#allocation5 + $0x210] ss:$24 sps:$4 sm:$0xff]  }
  0x58   :  { %1894 = vmatprep.subr.bf16.mxu0 %v3381_v17  ;;  %v3426_v47 = vld [vmem:[#allocation5 + $0x510] ss:$24 sps:$4 sm:$0xff]   ;;  %v80_v50 = vld [vmem:[#allocation3 + $0x68] sm:$0xff]  ;;  %v3433_v58 = vld [vmem:[#allocation5 + $0x274] ss:$24 sps:$4 sm:$0xff]   ;;  %vm2609_vm9 = vcmask 7168  }
  0x59   :  { %v79_v48 = vld [vmem:[#allocation3 + $0x60] sm:$0xff]  ;;  %v82_v49 = vld [vmem:[#allocation3 + $0x78] sm:$0xff]  ;;  %v3427_v52 = vld [vmem:[#allocation5 + $0x244] ss:$24 sps:$4 sm:$0xff]   ;;  %vm2612_vm11 = vcmask 15360   ;;  %vm2615_vm12 = vcmask 23552  }
  0x5a   :  { %1852 = vmatpush1.bf16.msra.mxu1 %v3383_v18  ;;  %v83_v51 = vld [vmem:[#allocation3 + $0x80] sm:$0xff]  ;;  %v4003_v53 = vcombine.high %v79_v48, %v82_v49  ;;  %v3429_v55 = vld [vmem:[#allocation5 + $0x544] ss:$24 sps:$4 sm:$0xff]   ;;  %v3431_v56 = vld [vmem:[#allocation5 + $0x240] ss:$24 sps:$4 sm:$0xff]   ;;  %v4009_v10 = vcombine.low %v79_v48, %v82_v49  ;;  %vm2618_vm13 = vcmask 31744  }
  0x5b   :  { %1895 = vmatpush1.bf16.msra.mxu0 %v3384_v19  ;;  %1853 = vmatprep.subr.bf16.mxu1 %v3385_v20  ;;  %v4005_v54 = vcombine.high %v80_v50, %v83_v51  ;;  %v3432_v57 = vld [vmem:[#allocation5 + $0x540] ss:$24 sps:$4 sm:$0xff]   ;;  %v3435_v59 = vld [vmem:[#allocation5 + $0x574] ss:$24 sps:$4 sm:$0xff]   ;;  %v3437_v60 = vld [vmem:[#allocation5 + $0x270] ss:$24 sps:$4 sm:$0xff]   ;;  %v4011_v11 = vcombine.low %v80_v50, %v83_v51 }
  0x5c   :  { %1896 = vmatprep.subr.bf16.mxu0 %v3387_v21  ;;  %1875 = vmatprep.mubr.bf16.mxu1 %v4003_v53  ;;  %v3438_v61 = vld [vmem:[#allocation5 + $0x570] ss:$24 sps:$4 sm:$0xff]   ;;  %v3439_v62 = vld [vmem:[#allocation5 + $0x2a4] ss:$24 sps:$4 sm:$0xff]   ;;  %v3443_v0 = vld [vmem:[#allocation5 + $0x2a0] ss:$24 sps:$4 sm:$0xff]  }
  0x5d   :  { %1918 = vmatprep.mubr.bf16.mxu0 %v4005_v54  ;;  %v3441_v63 = vld [vmem:[#allocation5 + $0x5a4] ss:$24 sps:$4 sm:$0xff]   ;;  %v3444_v1 = vld [vmem:[#allocation5 + $0x5a0] ss:$24 sps:$4 sm:$0xff]   ;;  %v3445_v2 = vld [vmem:[#allocation5 + $0x2d4] ss:$24 sps:$4 sm:$0xff]  }
  0x5e   :  { %1854 = vmatpush1.bf16.msra.mxu1 %v3389_v22  ;;  %v3447_v3 = vld [vmem:[#allocation5 + $0x5d4] ss:$24 sps:$4 sm:$0xff]   ;;  %v3449_v4 = vld [vmem:[#allocation5 + $0x2d0] ss:$24 sps:$4 sm:$0xff]   ;;  %v3455_v6 = vld [vmem:[#allocation5 + $0x604] ss:$24 sps:$4 sm:$0xff]  }
  0x5f   :  { %1897 = vmatpush1.bf16.msra.mxu0 %v3390_v23  ;;  %1855 = vmatprep.subr.bf16.mxu1 %v3391_v24  ;;  %v3450_v5 = vld [vmem:[#allocation5 + $0x5d0] ss:$24 sps:$4 sm:$0xff]   ;;  %v3458_v7 = vld [vmem:[#allocation5 + $0xc] ss:$24 sps:$4 sm:$0xff]   ;;  %v3453_v8 = vld [vmem:[#allocation5 + $0x600] ss:$24 sps:$4 sm:$0xff]  }
  0x60   :  { %1898 = vmatprep.subr.bf16.mxu0 %v3393_v25  ;;  %v3456_v9 = vld [vmem:[#allocation5 + $0x8] ss:$24 sps:$4 sm:$0xff]   ;;  %v3463_v12 = vld [vmem:[#allocation5 + $0x634] ss:$24 sps:$4 sm:$0xff]   ;;  %v3464_v15 = vld [vmem:[#allocation5 + $0x38] ss:$24 sps:$4 sm:$0xff]  }
  0x61   :  { %v3466_v13 = vld [vmem:[#allocation5 + $0x3c] ss:$24 sps:$4 sm:$0xff]   ;;  %v3461_v14 = vld [vmem:[#allocation5 + $0x630] ss:$24 sps:$4 sm:$0xff]   ;;  %v3472_v17 = vld [vmem:[#allocation5 + $0x6c] ss:$24 sps:$4 sm:$0xff]  }
  0x62   :  { %1856 = vmatpush1.bf16.msra.mxu1 %v3395_v26  ;;  %v3469_v16 = vld [vmem:[#allocation5 + $0x664] ss:$24 sps:$4 sm:$0xff]   ;;  %v3467_v18 = vld [vmem:[#allocation5 + $0x660] ss:$24 sps:$4 sm:$0xff]   ;;  %v3475_v20 = vld [vmem:[#allocation5 + $0x694] ss:$24 sps:$4 sm:$0xff]  }
  0x63   :  { %1899 = vmatpush1.bf16.msra.mxu0 %v3396_v27  ;;  %1857 = vmatprep.subr.bf16.mxu1 %v3397_v28  ;;  %v3470_v19 = vld [vmem:[#allocation5 + $0x68] ss:$24 sps:$4 sm:$0xff]   ;;  %v3478_v21 = vld [vmem:[#allocation5 + $0x9c] ss:$24 sps:$4 sm:$0xff]   ;;  %v3476_v23 = vld [vmem:[#allocation5 + $0x98] ss:$24 sps:$4 sm:$0xff]  }
  0x64   :  { %1900 = vmatprep.subr.bf16.mxu0 %v3399_v29  ;;  %v3473_v22 = vld [vmem:[#allocation5 + $0x690] ss:$24 sps:$4 sm:$0xff]   ;;  %v3481_v24 = vld [vmem:[#allocation5 + $0x6c4] ss:$24 sps:$4 sm:$0xff]   ;;  %v3479_v26 = vld [vmem:[#allocation5 + $0x6c0] ss:$24 sps:$4 sm:$0xff]  }
  0x65   :  { %v3484_v25 = vld [vmem:[#allocation5 + $0xcc] ss:$24 sps:$4 sm:$0xff]   ;;  %v3482_v27 = vld [vmem:[#allocation5 + $0xc8] ss:$24 sps:$4 sm:$0xff]   ;;  %v3490_v29 = vld [vmem:[#allocation5 + $0xfc] ss:$24 sps:$4 sm:$0xff]  }
  0x66   :  { %1858 = vmatpush1.bf16.msra.mxu1 %v3401_v30  ;;  %v3487_v28 = vld [vmem:[#allocation5 + $0x6f4] ss:$24 sps:$4 sm:$0xff]   ;;  %v3485_v30 = vld [vmem:[#allocation5 + $0x6f0] ss:$24 sps:$4 sm:$0xff]   ;;  %v3517_v51 = vld [vmem:[#allocation5 + $0x7e4] ss:$24 sps:$4 sm:$0xff]  }
  0x67   :  { %1901 = vmatpush1.bf16.msra.mxu0 %v3402_v31  ;;  %1859 = vmatprep.subr.bf16.mxu1 %v3403_v32  ;;  %v3488_v31 = vld [vmem:[#allocation5 + $0xf8] ss:$24 sps:$4 sm:$0xff]   ;;  %v3493_v32 = vld [vmem:[#allocation5 + $0x724] ss:$24 sps:$4 sm:$0xff]   ;;  %vm2975_vm15 = vcmask 39936  }
  0x68   :  { %1902 = vmatprep.subr.bf16.mxu0 %v3405_v33  ;;  %v3496_v33 = vld [vmem:[#allocation5 + $0x12c] ss:$24 sps:$4 sm:$0xff]   ;;  %v3514_v48 = vld [vmem:[#allocation5 + $0x1bc] ss:$24 sps:$4 sm:$0xff]   ;;  %v3509_v49 = vld [vmem:[#allocation5 + $0x7b0] ss:$24 sps:$4 sm:$0xff]  }
  0x69   :  { %v3512_v50 = vld [vmem:[#allocation5 + $0x1b8] ss:$24 sps:$4 sm:$0xff]  }
  0x6a   :  { %1860 = vmatpush1.bf16.msra.mxu1 %v3407_v34  ;;  %v4016_v34 = vld [vmem:[#allocation3 + $0x70] sm:$0xff] }
  0x6b   :  { %1903 = vmatpush1.bf16.msra.mxu0 %v3408_v35  ;;  %1861 = vmatprep.subr.bf16.mxu1 %v3409_v36  ;;  %v4018_v35 = vld [vmem:[#allocation3 + $0x88] sm:$0xff] }
  0x6c   :  { %1904 = vmatprep.subr.bf16.mxu0 %v3411_v37  ;;  %v3491_v36 = vld [vmem:[#allocation5 + $0x720] ss:$24 sps:$4 sm:$0xff]  }
  0x6d   :  { %v3494_v37 = vld [vmem:[#allocation5 + $0x128] ss:$24 sps:$4 sm:$0xff]  }
  0x6e   :  { %1862 = vmatpush1.bf16.msra.mxu1 %v3413_v38  ;;  %v4022_v38 = vcombine.high %v4016_v34, %v4018_v35 }
  0x6f   :  { %1905 = vmatpush1.bf16.msra.mxu0 %v3414_v39  ;;  %1863 = vmatprep.subr.bf16.mxu1 %v3415_v40  ;;  %v3499_v39 = vld [vmem:[#allocation5 + $0x754] ss:$24 sps:$4 sm:$0xff]  }
  0x70   :  { %1906 = vmatprep.subr.bf16.mxu0 %v3417_v41  ;;  %v3502_v40 = vld [vmem:[#allocation5 + $0x15c] ss:$24 sps:$4 sm:$0xff]   ;;  %v3497_v41 = vld [vmem:[#allocation5 + $0x750] ss:$24 sps:$4 sm:$0xff]  }
  0x72   :  { %1864 = vmatpush1.bf16.msra.mxu1 %v3419_v42  ;;  %v3500_v42 = vld [vmem:[#allocation5 + $0x158] ss:$24 sps:$4 sm:$0xff]  }
  0x73   :  { %1907 = vmatpush1.bf16.msra.mxu0 %v3420_v43  ;;  %1865 = vmatprep.subr.bf16.mxu1 %v3421_v44  ;;  %v3505_v43 = vld [vmem:[#allocation5 + $0x784] ss:$24 sps:$4 sm:$0xff]  }
  0x74   :  { %1908 = vmatprep.subr.bf16.mxu0 %v3423_v45  ;;  %v3508_v44 = vld [vmem:[#allocation5 + $0x18c] ss:$24 sps:$4 sm:$0xff]   ;;  %v3503_v45 = vld [vmem:[#allocation5 + $0x780] ss:$24 sps:$4 sm:$0xff]  }
  0x76   :  { %1866 = vmatpush1.bf16.msra.mxu1 %v3425_v46  ;;  %v3506_v46 = vld [vmem:[#allocation5 + $0x188] ss:$24 sps:$4 sm:$0xff]  }
  0x77   :  { %1909 = vmatpush1.bf16.msra.mxu0 %v3426_v47  ;;  %1867 = vmatprep.subr.bf16.mxu1 %v3427_v52  ;;  %v3511_v47 = vld [vmem:[#allocation5 + $0x7b4] ss:$24 sps:$4 sm:$0xff]  }
  0x78   :  { %1910 = vmatprep.subr.bf16.mxu0 %v3429_v55  ;;  %v3520_v52 = vld [vmem:[#allocation5 + $0x1ec] ss:$24 sps:$4 sm:$0xff]   ;;  %v3515_v55 = vld [vmem:[#allocation5 + $0x7e0] ss:$24 sps:$4 sm:$0xff]  }
  0x7a   :  { %1868 = vmatpush1.bf16.msra.mxu1 %v3431_v56  ;;  %v3518_v56 = vld [vmem:[#allocation5 + $0x1e8] ss:$24 sps:$4 sm:$0xff]  }
  0x7b   :  { %1911 = vmatpush1.bf16.msra.mxu0 %v3432_v57  ;;  %1869 = vmatprep.subr.bf16.mxu1 %v3433_v58  ;;  %v3523_v57 = vld [vmem:[#allocation5 + $0x814] ss:$24 sps:$4 sm:$0xff]  }
  0x7c   :  { %1912 = vmatprep.subr.bf16.mxu0 %v3435_v59  ;;  %v3526_v58 = vld [vmem:[#allocation5 + $0x21c] ss:$24 sps:$4 sm:$0xff]   ;;  %v3521_v59 = vld [vmem:[#allocation5 + $0x810] ss:$24 sps:$4 sm:$0xff]  }
  0x7e   :  { %1870 = vmatpush1.bf16.msra.mxu1 %v3437_v60  ;;  %v3524_v60 = vld [vmem:[#allocation5 + $0x218] ss:$24 sps:$4 sm:$0xff]  }
  0x7f   :  { %1913 = vmatpush1.bf16.msra.mxu0 %v3438_v61  ;;  %1871 = vmatprep.subr.bf16.mxu1 %v3439_v62  ;;  %v3529_v61 = vld [vmem:[#allocation5 + $0x844] ss:$24 sps:$4 sm:$0xff]  }
  0x80   :  { %1914 = vmatprep.subr.bf16.mxu0 %v3441_v63  ;;  %v3532_v62 = vld [vmem:[#allocation5 + $0x24c] ss:$24 sps:$4 sm:$0xff]   ;;  %v3527_v63 = vld [vmem:[#allocation5 + $0x840] ss:$24 sps:$4 sm:$0xff]  }
  0x82   :  { %1872 = vmatpush1.bf16.msra.mxu1 %v3443_v0  ;;  %v3530_v0 = vld [vmem:[#allocation5 + $0x248] ss:$24 sps:$4 sm:$0xff]  }
  0x83   :  { %1915 = vmatpush1.bf16.msra.mxu0 %v3444_v1  ;;  %1873 = vmatprep.subr.bf16.mxu1 %v3445_v2  ;;  %v3535_v1 = vld [vmem:[#allocation5 + $0x874] ss:$24 sps:$4 sm:$0xff]  }
  0x84   :  { %1916 = vmatprep.subr.bf16.mxu0 %v3447_v3  ;;  %v3538_v2 = vld [vmem:[#allocation5 + $0x27c] ss:$24 sps:$4 sm:$0xff]   ;;  %v3533_v3 = vld [vmem:[#allocation5 + $0x870] ss:$24 sps:$4 sm:$0xff]  }
  0x86   :  { %1874 = vmatpush1.bf16.msra.mxu1 %v3449_v4  ;;  %v3536_v4 = vld [vmem:[#allocation5 + $0x278] ss:$24 sps:$4 sm:$0xff]  }
  0x87   :  { %1917 = vmatpush1.bf16.msra.mxu0 %v3450_v5  ;;  %1972 = vmatprep.subr.bf16.mxu1 %v3458_v7  ;;  %v3541_v5 = vld [vmem:[#allocation5 + $0x8a4] ss:$24 sps:$4 sm:$0xff]   ;;  %v3539_v7 = vld [vmem:[#allocation5 + $0x8a0] ss:$24 sps:$4 sm:$0xff]  }
  0x88   :  { %1929 = vmatprep.subr.bf16.mxu0 %v3455_v6  ;;  %v3544_v6 = vld [vmem:[#allocation5 + $0x2ac] ss:$24 sps:$4 sm:$0xff]  }
  0x89   :  { %1876 = vmatmul.mubr.bf16.vlgmr.msra.gmra.mrb[0].mxu1 %v4009_v10 }
  0x8a   :  { %1919 = vmatmul.mubr.bf16.vlgmr.msra.gmra.mrb[0].mxu0 %v4011_v11  ;;  %1973 = vmatpush1.bf16.msra.mxu1 %v3456_v9  ;;  %v3547_v9 = vld [vmem:[#allocation5 + $0x8d4] ss:$24 sps:$4 sm:$0xff]  }
  0x8b   :  { %1930 = vmatpush1.bf16.msra.mxu0 %v3453_v8  ;;  %1974 = vmatprep.subr.bf16.mxu1 %v3466_v13  ;;  %v3542_v8 = vld [vmem:[#allocation5 + $0x2a8] ss:$24 sps:$4 sm:$0xff]  }
  0x8c   :  { %1931 = vmatprep.subr.bf16.mxu0 %v3463_v12  ;;  %2004 = vmatprep.mubr.bf16.mxu1 %v4003_v53  ;;  %v3550_v12 = vld [vmem:[#allocation5 + $0x2dc] ss:$24 sps:$4 sm:$0xff]   ;;  %v3545_v13 = vld [vmem:[#allocation5 + $0x8d0] ss:$24 sps:$4 sm:$0xff]  }
  0x8d   :  { %1961 = vmatprep.mubr.bf16.mxu0 %v4022_v38 }
  0x8e   :  { %1975 = vmatpush1.bf16.msra.mxu1 %v3464_v15  ;;  %v3555_v15 = vld [vmem:[#allocation5 + $0x30c] ss:$24 sps:$4 sm:$0xff]  }
  0x8f   :  { %1932 = vmatpush1.bf16.msra.mxu0 %v3461_v14  ;;  %1976 = vmatprep.subr.bf16.mxu1 %v3472_v17  ;;  %v3548_v14 = vld [vmem:[#allocation5 + $0x2d8] ss:$24 sps:$4 sm:$0xff]   ;;  %v4027_v17 = vcombine.low %v4016_v34, %v4018_v35  ;;  %v3577_v34 = vld [vmem:[#allocation5 + $0x3c8] ss:$24 sps:$4 sm:$0xff]   ;;  %v3585_v35 = vld [vmem:[#allocation5 + $0x3fc] ss:$24 sps:$4 sm:$0xff]  }
  0x90   :  { %1933 = vmatprep.subr.bf16.mxu0 %v3469_v16  ;;  %v3558_v16 = vld [vmem:[#allocation5 + $0x14] ss:$24 sps:$4 sm:$0xff]  }
  0x92   :  { %1977 = vmatpush1.bf16.msra.mxu1 %v3470_v19  ;;  %v3556_v19 = vld [vmem:[#allocation5 + $0x10] ss:$24 sps:$4 sm:$0xff]  }
  0x93   :  { %1934 = vmatpush1.bf16.msra.mxu0 %v3467_v18  ;;  %1978 = vmatprep.subr.bf16.mxu1 %v3478_v21  ;;  %v3553_v18 = vld [vmem:[#allocation5 + $0x308] ss:$24 sps:$4 sm:$0xff]   ;;  %v3564_v21 = vld [vmem:[#allocation5 + $0x44] ss:$24 sps:$4 sm:$0xff]  }
  0x94   :  { %1935 = vmatprep.subr.bf16.mxu0 %v3475_v20  ;;  %v3561_v20 = vld [vmem:[#allocation5 + $0x33c] ss:$24 sps:$4 sm:$0xff]  }
  0x96   :  { %1979 = vmatpush1.bf16.msra.mxu1 %v3476_v23  ;;  %v3562_v23 = vld [vmem:[#allocation5 + $0x40] ss:$24 sps:$4 sm:$0xff]  }
  0x97   :  { %1936 = vmatpush1.bf16.msra.mxu0 %v3473_v22  ;;  %1980 = vmatprep.subr.bf16.mxu1 %v3484_v25  ;;  %v3559_v22 = vld [vmem:[#allocation5 + $0x338] ss:$24 sps:$4 sm:$0xff]   ;;  %v3570_v25 = vld [vmem:[#allocation5 + $0x74] ss:$24 sps:$4 sm:$0xff]  }
  0x98   :  { %1937 = vmatprep.subr.bf16.mxu0 %v3481_v24  ;;  %v3567_v24 = vld [vmem:[#allocation5 + $0x36c] ss:$24 sps:$4 sm:$0xff]  }
  0x9a   :  { %1981 = vmatpush1.bf16.msra.mxu1 %v3482_v27  ;;  %v3568_v27 = vld [vmem:[#allocation5 + $0x70] ss:$24 sps:$4 sm:$0xff]  }
  0x9b   :  { %1938 = vmatpush1.bf16.msra.mxu0 %v3479_v26  ;;  %1982 = vmatprep.subr.bf16.mxu1 %v3490_v29  ;;  %v3565_v26 = vld [vmem:[#allocation5 + $0x368] ss:$24 sps:$4 sm:$0xff]   ;;  %v3576_v29 = vld [vmem:[#allocation5 + $0xa4] ss:$24 sps:$4 sm:$0xff]  }
  0x9c   :  { %1939 = vmatprep.subr.bf16.mxu0 %v3487_v28  ;;  %v3573_v28 = vld [vmem:[#allocation5 + $0x39c] ss:$24 sps:$4 sm:$0xff]  }
  0x9e   :  { %1983 = vmatpush1.bf16.msra.mxu1 %v3488_v31  ;;  %v3574_v31 = vld [vmem:[#allocation5 + $0xa0] ss:$24 sps:$4 sm:$0xff]  }
  0x9f   :  { %1940 = vmatpush1.bf16.msra.mxu0 %v3485_v30  ;;  %1984 = vmatprep.subr.bf16.mxu1 %v3496_v33  ;;  %v3571_v30 = vld [vmem:[#allocation5 + $0x398] ss:$24 sps:$4 sm:$0xff]   ;;  %v3582_v33 = vld [vmem:[#allocation5 + $0xd4] ss:$24 sps:$4 sm:$0xff]  }
  0xa0   :  { %1941 = vmatprep.subr.bf16.mxu0 %v3493_v32  ;;  %v3579_v32 = vld [vmem:[#allocation5 + $0x3cc] ss:$24 sps:$4 sm:$0xff]  }
  0xa2   :  { %1985 = vmatpush1.bf16.msra.mxu1 %v3494_v37  ;;  %v3583_v37 = vld [vmem:[#allocation5 + $0x3f8] ss:$24 sps:$4 sm:$0xff]  }
  0xa3   :  { %1942 = vmatpush1.bf16.msra.mxu0 %v3491_v36  ;;  %1986 = vmatprep.subr.bf16.mxu1 %v3502_v40  ;;  %v3588_v36 = vld [vmem:[#allocation5 + $0x104] ss:$24 sps:$4 sm:$0xff]  }
  0xa4   :  { %1943 = vmatprep.subr.bf16.mxu0 %v3499_v39  ;;  %v3586_v39 = vld [vmem:[#allocation5 + $0x100] ss:$24 sps:$4 sm:$0xff]   ;;  %v3591_v40 = vld [vmem:[#allocation5 + $0x42c] ss:$24 sps:$4 sm:$0xff]  }
  0xa6   :  { %1987 = vmatpush1.bf16.msra.mxu1 %v3500_v42  ;;  %v3589_v42 = vld [vmem:[#allocation5 + $0x428] ss:$24 sps:$4 sm:$0xff]  }
  0xa7   :  { %1944 = vmatpush1.bf16.msra.mxu0 %v3497_v41  ;;  %1988 = vmatprep.subr.bf16.mxu1 %v3508_v44  ;;  %v3594_v41 = vld [vmem:[#allocation5 + $0x134] ss:$24 sps:$4 sm:$0xff]  }
  0xa8   :  { %1945 = vmatprep.subr.bf16.mxu0 %v3505_v43  ;;  %v3592_v43 = vld [vmem:[#allocation5 + $0x130] ss:$24 sps:$4 sm:$0xff]   ;;  %v3597_v44 = vld [vmem:[#allocation5 + $0x45c] ss:$24 sps:$4 sm:$0xff]  }
  0xaa   :  { %1989 = vmatpush1.bf16.msra.mxu1 %v3506_v46  ;;  %v3595_v46 = vld [vmem:[#allocation5 + $0x458] ss:$24 sps:$4 sm:$0xff]  }
  0xab   :  { %1946 = vmatpush1.bf16.msra.mxu0 %v3503_v45  ;;  %1990 = vmatprep.subr.bf16.mxu1 %v3514_v48  ;;  %v3600_v45 = vld [vmem:[#allocation5 + $0x164] ss:$24 sps:$4 sm:$0xff]  }
  0xac   :  { %1947 = vmatprep.subr.bf16.mxu0 %v3511_v47  ;;  %v3598_v47 = vld [vmem:[#allocation5 + $0x160] ss:$24 sps:$4 sm:$0xff]   ;;  %v3603_v48 = vld [vmem:[#allocation5 + $0x48c] ss:$24 sps:$4 sm:$0xff]  }
  0xae   :  { %1991 = vmatpush1.bf16.msra.mxu1 %v3512_v50  ;;  %v3601_v50 = vld [vmem:[#allocation5 + $0x488] ss:$24 sps:$4 sm:$0xff]  }
  0xaf   :  { %1948 = vmatpush1.bf16.msra.mxu0 %v3509_v49  ;;  %1992 = vmatprep.subr.bf16.mxu1 %v3520_v52  ;;  %v3606_v49 = vld [vmem:[#allocation5 + $0x194] ss:$24 sps:$4 sm:$0xff]  }
  0xb0   :  { %1949 = vmatprep.subr.bf16.mxu0 %v3517_v51  ;;  %v3604_v51 = vld [vmem:[#allocation5 + $0x190] ss:$24 sps:$4 sm:$0xff]   ;;  %v3609_v52 = vld [vmem:[#allocation5 + $0x4bc] ss:$24 sps:$4 sm:$0xff]  }
  0xb2   :  { %1993 = vmatpush1.bf16.msra.mxu1 %v3518_v56  ;;  %v3607_v56 = vld [vmem:[#allocation5 + $0x4b8] ss:$24 sps:$4 sm:$0xff]  }
  0xb3   :  { %1950 = vmatpush1.bf16.msra.mxu0 %v3515_v55  ;;  %1994 = vmatprep.subr.bf16.mxu1 %v3526_v58  ;;  %v3612_v55 = vld [vmem:[#allocation5 + $0x1c4] ss:$24 sps:$4 sm:$0xff]  }
  0xb4   :  { %1951 = vmatprep.subr.bf16.mxu0 %v3523_v57  ;;  %v3610_v57 = vld [vmem:[#allocation5 + $0x1c0] ss:$24 sps:$4 sm:$0xff]   ;;  %v3615_v58 = vld [vmem:[#allocation5 + $0x4ec] ss:$24 sps:$4 sm:$0xff]  }
  0xb6   :  { %1995 = vmatpush1.bf16.msra.mxu1 %v3524_v60  ;;  %v3613_v60 = vld [vmem:[#allocation5 + $0x4e8] ss:$24 sps:$4 sm:$0xff]  }
  0xb7   :  { %1952 = vmatpush1.bf16.msra.mxu0 %v3521_v59  ;;  %1996 = vmatprep.subr.bf16.mxu1 %v3532_v62  ;;  %v3618_v59 = vld [vmem:[#allocation5 + $0x1f4] ss:$24 sps:$4 sm:$0xff]  }
  0xb8   :  { %1953 = vmatprep.subr.bf16.mxu0 %v3529_v61  ;;  %v3616_v61 = vld [vmem:[#allocation5 + $0x1f0] ss:$24 sps:$4 sm:$0xff]   ;;  %v3621_v62 = vld [vmem:[#allocation5 + $0x51c] ss:$24 sps:$4 sm:$0xff]  }
  0xba   :  { %1997 = vmatpush1.bf16.msra.mxu1 %v3530_v0  ;;  %v3619_v0 = vld [vmem:[#allocation5 + $0x518] ss:$24 sps:$4 sm:$0xff]  }
  0xbb   :  { %1954 = vmatpush1.bf16.msra.mxu0 %v3527_v63  ;;  %1998 = vmatprep.subr.bf16.mxu1 %v3538_v2  ;;  %v3624_v63 = vld [vmem:[#allocation5 + $0x224] ss:$24 sps:$4 sm:$0xff]  }
  0xbc   :  { %1955 = vmatprep.subr.bf16.mxu0 %v3535_v1  ;;  %v3622_v1 = vld [vmem:[#allocation5 + $0x220] ss:$24 sps:$4 sm:$0xff]   ;;  %v3627_v2 = vld [vmem:[#allocation5 + $0x54c] ss:$24 sps:$4 sm:$0xff]  }
  0xbe   :  { %1999 = vmatpush1.bf16.msra.mxu1 %v3536_v4  ;;  %v3625_v4 = vld [vmem:[#allocation5 + $0x548] ss:$24 sps:$4 sm:$0xff]  }
  0xbf   :  { %1956 = vmatpush1.bf16.msra.mxu0 %v3533_v3  ;;  %2000 = vmatprep.subr.bf16.mxu1 %v3544_v6  ;;  %v3630_v3 = vld [vmem:[#allocation5 + $0x254] ss:$24 sps:$4 sm:$0xff]  }
  0xc0   :  { %1957 = vmatprep.subr.bf16.mxu0 %v3541_v5  ;;  %v3628_v5 = vld [vmem:[#allocation5 + $0x250] ss:$24 sps:$4 sm:$0xff]   ;;  %v3633_v6 = vld [vmem:[#allocation5 + $0x57c] ss:$24 sps:$4 sm:$0xff]  }
  0xc2   :  { %2001 = vmatpush1.bf16.msra.mxu1 %v3542_v8  ;;  %v3631_v8 = vld [vmem:[#allocation5 + $0x578] ss:$24 sps:$4 sm:$0xff]  }
  0xc3   :  { %1958 = vmatpush1.bf16.msra.mxu0 %v3539_v7  ;;  %2002 = vmatprep.subr.bf16.mxu1 %v3550_v12  ;;  %v3636_v7 = vld [vmem:[#allocation5 + $0x284] ss:$24 sps:$4 sm:$0xff]  }
  0xc4   :  { %1959 = vmatprep.subr.bf16.mxu0 %v3547_v9  ;;  %v3634_v9 = vld [vmem:[#allocation5 + $0x280] ss:$24 sps:$4 sm:$0xff]   ;;  %v3639_v12 = vld [vmem:[#allocation5 + $0x5ac] ss:$24 sps:$4 sm:$0xff]  }
  0xc6   :  { %2003 = vmatpush1.bf16.msra.mxu1 %v3548_v14  ;;  %v3637_v14 = vld [vmem:[#allocation5 + $0x5a8] ss:$24 sps:$4 sm:$0xff]  }
  0xc7   :  { %1960 = vmatpush1.bf16.msra.mxu0 %v3545_v13  ;;  %2015 = vmatprep.subr.bf16.mxu1 %v3555_v15  ;;  %v3642_v13 = vld [vmem:[#allocation5 + $0x2b4] ss:$24 sps:$4 sm:$0xff]   ;;  %v3640_v15 = vld [vmem:[#allocation5 + $0x2b0] ss:$24 sps:$4 sm:$0xff]  }
  0xc8   :  { %2101 = vmatprep.subr.bf16.mxu0 %v3558_v16  ;;  %v3645_v16 = vld [vmem:[#allocation5 + $0x5dc] ss:$24 sps:$4 sm:$0xff]  }
  0xc9   :  { %2005 = vmatmul.mubr.bf16.vlgmr.msra.gmra.mrb[4].mxu1 %v4009_v10 }
  0xca   :  { %1962 = vmatmul.mubr.bf16.vlgmr.msra.gmra.mrb[0].mxu0 %v4027_v17  ;;  %2016 = vmatpush1.bf16.msra.mxu1 %v3553_v18  ;;  %v3648_v18 = vld [vmem:[#allocation5 + $0x2e4] ss:$24 sps:$4 sm:$0xff]  }
  0xcb   :  { %2102 = vmatpush1.bf16.msra.mxu0 %v3556_v19  ;;  %2017 = vmatprep.subr.bf16.mxu1 %v3561_v20  ;;  %v3643_v19 = vld [vmem:[#allocation5 + $0x5d8] ss:$24 sps:$4 sm:$0xff]  }
  0xcc   :  { %2103 = vmatprep.subr.bf16.mxu0 %v3564_v21  ;;  %2047 = vmatprep.mubr.bf16.mxu1 %v4005_v54  ;;  %v3646_v20 = vld [vmem:[#allocation5 + $0x2e0] ss:$24 sps:$4 sm:$0xff]   ;;  %v3651_v21 = vld [vmem:[#allocation5 + $0x60c] ss:$24 sps:$4 sm:$0xff]  }
  0xcd   :  { %2133 = vmatprep.mubr.bf16.mxu0 %v4003_v53  ;;  %v3580_v53 = vld [vmem:[#allocation5 + $0xd0] ss:$24 sps:$4 sm:$0xff]  }
  0xce   :  { %2018 = vmatpush1.bf16.msra.mxu1 %v3559_v22  ;;  %v3654_v22 = vld [vmem:[#allocation5 + $0x314] ss:$24 sps:$4 sm:$0xff]  }
  0xcf   :  { %2104 = vmatpush1.bf16.msra.mxu0 %v3562_v23  ;;  %2019 = vmatprep.subr.bf16.mxu1 %v3567_v24  ;;  %v3649_v23 = vld [vmem:[#allocation5 + $0x608] ss:$24 sps:$4 sm:$0xff]  }
  0xd0   :  { %2105 = vmatprep.subr.bf16.mxu0 %v3570_v25  ;;  %v3652_v24 = vld [vmem:[#allocation5 + $0x310] ss:$24 sps:$4 sm:$0xff]   ;;  %v3657_v25 = vld [vmem:[#allocation5 + $0x63c] ss:$24 sps:$4 sm:$0xff]  }
  0xd2   :  { %2020 = vmatpush1.bf16.msra.mxu1 %v3565_v26  ;;  %v3660_v26 = vld [vmem:[#allocation5 + $0x344] ss:$24 sps:$4 sm:$0xff]  }
  0xd3   :  { %2106 = vmatpush1.bf16.msra.mxu0 %v3568_v27  ;;  %2021 = vmatprep.subr.bf16.mxu1 %v3573_v28  ;;  %v3655_v27 = vld [vmem:[#allocation5 + $0x638] ss:$24 sps:$4 sm:$0xff]  }
  0xd4   :  { %2107 = vmatprep.subr.bf16.mxu0 %v3576_v29  ;;  %v3658_v28 = vld [vmem:[#allocation5 + $0x340] ss:$24 sps:$4 sm:$0xff]   ;;  %v3663_v29 = vld [vmem:[#allocation5 + $0x66c] ss:$24 sps:$4 sm:$0xff]  }
  0xd6   :  { %2022 = vmatpush1.bf16.msra.mxu1 %v3571_v30  ;;  %v3666_v30 = vld [vmem:[#allocation5 + $0x374] ss:$24 sps:$4 sm:$0xff]  }
  0xd7   :  { %2108 = vmatpush1.bf16.msra.mxu0 %v3574_v31  ;;  %2023 = vmatprep.subr.bf16.mxu1 %v3579_v32  ;;  %v3661_v31 = vld [vmem:[#allocation5 + $0x668] ss:$24 sps:$4 sm:$0xff]  }
  0xd8   :  { %2109 = vmatprep.subr.bf16.mxu0 %v3582_v33  ;;  %v3664_v32 = vld [vmem:[#allocation5 + $0x370] ss:$24 sps:$4 sm:$0xff]   ;;  %v3669_v33 = vld [vmem:[#allocation5 + $0x69c] ss:$24 sps:$4 sm:$0xff]  }
  0xda   :  { %2024 = vmatpush1.bf16.msra.mxu1 %v3577_v34  ;;  %v3667_v34 = vld [vmem:[#allocation5 + $0x698] ss:$24 sps:$4 sm:$0xff]  }
  0xdb   :  { %2110 = vmatpush1.bf16.msra.mxu0 %v3580_v53  ;;  %2025 = vmatprep.subr.bf16.mxu1 %v3585_v35  ;;  %v3670_v53 = vld [vmem:[#allocation5 + $0x3a0] ss:$24 sps:$4 sm:$0xff]   ;;  %v3675_v35 = vld [vmem:[#allocation5 + $0x6cc] ss:$24 sps:$4 sm:$0xff]  }
  0xdc   :  { %2111 = vmatprep.subr.bf16.mxu0 %v3588_v36  ;;  %v3678_v36 = vld [vmem:[#allocation5 + $0x3d4] ss:$24 sps:$4 sm:$0xff]  }
  0xde   :  { %2026 = vmatpush1.bf16.msra.mxu1 %v3583_v37  ;;  %v3673_v37 = vld [vmem:[#allocation5 + $0x6c8] ss:$24 sps:$4 sm:$0xff]  }
  0xdf   :  { %2112 = vmatpush1.bf16.msra.mxu0 %v3586_v39  ;;  %2027 = vmatprep.subr.bf16.mxu1 %v3591_v40  ;;  %v3681_v39 = vld [vmem:[#allocation5 + $0x6fc] ss:$24 sps:$4 sm:$0xff]  }
  0xe0   :  { %2113 = vmatprep.subr.bf16.mxu0 %v3594_v41  ;;  %v3684_v40 = vld [vmem:[#allocation5 + $0x404] ss:$24 sps:$4 sm:$0xff]   ;;  %v3679_v41 = vld [vmem:[#allocation5 + $0x6f8] ss:$24 sps:$4 sm:$0xff]  }
  0xe2   :  { %2028 = vmatpush1.bf16.msra.mxu1 %v3589_v42  ;;  %v3682_v42 = vld [vmem:[#allocation5 + $0x400] ss:$24 sps:$4 sm:$0xff]  }
  0xe3   :  { %2114 = vmatpush1.bf16.msra.mxu0 %v3592_v43  ;;  %2029 = vmatprep.subr.bf16.mxu1 %v3597_v44  ;;  %v3687_v43 = vld [vmem:[#allocation5 + $0x72c] ss:$24 sps:$4 sm:$0xff]  }
  0xe4   :  { %2115 = vmatprep.subr.bf16.mxu0 %v3600_v45  ;;  %v3690_v44 = vld [vmem:[#allocation5 + $0x434] ss:$24 sps:$4 sm:$0xff]   ;;  %v3685_v45 = vld [vmem:[#allocation5 + $0x728] ss:$24 sps:$4 sm:$0xff]  }
  0xe6   :  { %2030 = vmatpush1.bf16.msra.mxu1 %v3595_v46  ;;  %v3688_v46 = vld [vmem:[#allocation5 + $0x430] ss:$24 sps:$4 sm:$0xff]  }
  0xe7   :  { %2116 = vmatpush1.bf16.msra.mxu0 %v3598_v47  ;;  %2031 = vmatprep.subr.bf16.mxu1 %v3603_v48  ;;  %v3693_v47 = vld [vmem:[#allocation5 + $0x75c] ss:$24 sps:$4 sm:$0xff]  }
  0xe8   :  { %2117 = vmatprep.subr.bf16.mxu0 %v3606_v49  ;;  %v3696_v48 = vld [vmem:[#allocation5 + $0x464] ss:$24 sps:$4 sm:$0xff]   ;;  %v3691_v49 = vld [vmem:[#allocation5 + $0x758] ss:$24 sps:$4 sm:$0xff]  }
  0xea   :  { %2032 = vmatpush1.bf16.msra.mxu1 %v3601_v50  ;;  %v3694_v50 = vld [vmem:[#allocation5 + $0x460] ss:$24 sps:$4 sm:$0xff]  }
  0xeb   :  { %2118 = vmatpush1.bf16.msra.mxu0 %v3604_v51  ;;  %2033 = vmatprep.subr.bf16.mxu1 %v3609_v52  ;;  %v3699_v51 = vld [vmem:[#allocation5 + $0x78c] ss:$24 sps:$4 sm:$0xff]  }
  0xec   :  { %2119 = vmatprep.subr.bf16.mxu0 %v3612_v55  ;;  %v3702_v52 = vld [vmem:[#allocation5 + $0x494] ss:$24 sps:$4 sm:$0xff]   ;;  %v3697_v55 = vld [vmem:[#allocation5 + $0x788] ss:$24 sps:$4 sm:$0xff]  }
  0xee   :  { %2034 = vmatpush1.bf16.msra.mxu1 %v3607_v56  ;;  %v3700_v56 = vld [vmem:[#allocation5 + $0x490] ss:$24 sps:$4 sm:$0xff]  }
  0xef   :  { %2120 = vmatpush1.bf16.msra.mxu0 %v3610_v57  ;;  %2035 = vmatprep.subr.bf16.mxu1 %v3615_v58  ;;  %v3705_v57 = vld [vmem:[#allocation5 + $0x7bc] ss:$24 sps:$4 sm:$0xff]  }
  0xf0   :  { %2121 = vmatprep.subr.bf16.mxu0 %v3618_v59  ;;  %v3708_v58 = vld [vmem:[#allocation5 + $0x4c4] ss:$24 sps:$4 sm:$0xff]   ;;  %v3703_v59 = vld [vmem:[#allocation5 + $0x7b8] ss:$24 sps:$4 sm:$0xff]  }
  0xf2   :  { %2036 = vmatpush1.bf16.msra.mxu1 %v3613_v60  ;;  %v3706_v60 = vld [vmem:[#allocation5 + $0x4c0] ss:$24 sps:$4 sm:$0xff]  }
  0xf3   :  { %2122 = vmatpush1.bf16.msra.mxu0 %v3616_v61  ;;  %2037 = vmatprep.subr.bf16.mxu1 %v3621_v62  ;;  %v3711_v61 = vld [vmem:[#allocation5 + $0x7ec] ss:$24 sps:$4 sm:$0xff]  }
  0xf4   :  { %2123 = vmatprep.subr.bf16.mxu0 %v3624_v63  ;;  %v3714_v62 = vld [vmem:[#allocation5 + $0x4f4] ss:$24 sps:$4 sm:$0xff]   ;;  %v3709_v63 = vld [vmem:[#allocation5 + $0x7e8] ss:$24 sps:$4 sm:$0xff]  }
  0xf6   :  { %2038 = vmatpush1.bf16.msra.mxu1 %v3619_v0  ;;  %v3712_v0 = vld [vmem:[#allocation5 + $0x4f0] ss:$24 sps:$4 sm:$0xff]  }
  0xf7   :  { %2124 = vmatpush1.bf16.msra.mxu0 %v3622_v1  ;;  %2039 = vmatprep.subr.bf16.mxu1 %v3627_v2  ;;  %v3717_v1 = vld [vmem:[#allocation5 + $0x81c] ss:$24 sps:$4 sm:$0xff]  }
  0xf8   :  { %2125 = vmatprep.subr.bf16.mxu0 %v3630_v3  ;;  %v3720_v2 = vld [vmem:[#allocation5 + $0x524] ss:$24 sps:$4 sm:$0xff]   ;;  %v3715_v3 = vld [vmem:[#allocation5 + $0x818] ss:$24 sps:$4 sm:$0xff]  }
  0xfa   :  { %2040 = vmatpush1.bf16.msra.mxu1 %v3625_v4  ;;  %v3718_v4 = vld [vmem:[#allocation5 + $0x520] ss:$24 sps:$4 sm:$0xff]  }
  0xfb   :  { %2126 = vmatpush1.bf16.msra.mxu0 %v3628_v5  ;;  %2041 = vmatprep.subr.bf16.mxu1 %v3633_v6  ;;  %v3723_v5 = vld [vmem:[#allocation5 + $0x84c] ss:$24 sps:$4 sm:$0xff]  }
  0xfc   :  { %2127 = vmatprep.subr.bf16.mxu0 %v3636_v7  ;;  %v3726_v6 = vld [vmem:[#allocation5 + $0x554] ss:$24 sps:$4 sm:$0xff]   ;;  %v3721_v7 = vld [vmem:[#allocation5 + $0x848] ss:$24 sps:$4 sm:$0xff]  }
  0xfe   :  { %2042 = vmatpush1.bf16.msra.mxu1 %v3631_v8  ;;  %v3724_v8 = vld [vmem:[#allocation5 + $0x550] ss:$24 sps:$4 sm:$0xff]  }
  0xff   :  { %2128 = vmatpush1.bf16.msra.mxu0 %v3634_v9  ;;  %2043 = vmatprep.subr.bf16.mxu1 %v3639_v12  ;;  %v3729_v9 = vld [vmem:[#allocation5 + $0x87c] ss:$24 sps:$4 sm:$0xff]  }
 0x100   :  { %2129 = vmatprep.subr.bf16.mxu0 %v3642_v13  ;;  %v3732_v12 = vld [vmem:[#allocation5 + $0x584] ss:$24 sps:$4 sm:$0xff]   ;;  %v3727_v13 = vld [vmem:[#allocation5 + $0x878] ss:$24 sps:$4 sm:$0xff]  }
 0x102   :  { %2044 = vmatpush1.bf16.msra.mxu1 %v3637_v14  ;;  %v3730_v14 = vld [vmem:[#allocation5 + $0x580] ss:$24 sps:$4 sm:$0xff]  }
 0x103   :  { %2130 = vmatpush1.bf16.msra.mxu0 %v3640_v15  ;;  %2045 = vmatprep.subr.bf16.mxu1 %v3645_v16  ;;  %v3735_v15 = vld [vmem:[#allocation5 + $0x8ac] ss:$24 sps:$4 sm:$0xff]  }
 0x104   :  { %2131 = vmatprep.subr.bf16.mxu0 %v3648_v18  ;;  %v3738_v16 = vld [vmem:[#allocation5 + $0x5b4] ss:$24 sps:$4 sm:$0xff]   ;;  %v3733_v18 = vld [vmem:[#allocation5 + $0x8a8] ss:$24 sps:$4 sm:$0xff]  }
 0x106   :  { %2046 = vmatpush1.bf16.msra.mxu1 %v3643_v19  ;;  %v3736_v19 = vld [vmem:[#allocation5 + $0x5b0] ss:$24 sps:$4 sm:$0xff]  }
 0x107   :  { %2132 = vmatpush1.bf16.msra.mxu0 %v3646_v20  ;;  %2058 = vmatprep.subr.bf16.mxu1 %v3651_v21  ;;  %v3741_v20 = vld [vmem:[#allocation5 + $0x8dc] ss:$24 sps:$4 sm:$0xff]  }
 0x108   :  { %2144 = vmatprep.subr.bf16.mxu0 %v3654_v22  ;;  %v3744_v21 = vld [vmem:[#allocation5 + $0x5e4] ss:$24 sps:$4 sm:$0xff]   ;;  %v3739_v22 = vld [vmem:[#allocation5 + $0x8d8] ss:$24 sps:$4 sm:$0xff]  }
 0x109   :  { %2048 = vmatmul.mubr.bf16.vlgmr.msra.gmra.mrb[4].mxu1 %v4011_v11 }
 0x10a   :  { %2134 = vmatmul.mubr.bf16.vlgmr.msra.gmra.mrb[4].mxu0 %v4009_v10  ;;  %2059 = vmatpush1.bf16.msra.mxu1 %v3649_v23  ;;  %v3672_v10 = vld [vmem:[#allocation5 + $0x3a4] ss:$24 sps:$4 sm:$0xff]   ;;  %v3742_v23 = vld [vmem:[#allocation5 + $0x5e0] ss:$24 sps:$4 sm:$0xff]  }
 0x10b   :  { %2145 = vmatpush1.bf16.msra.mxu0 %v3652_v24  ;;  %2060 = vmatprep.subr.bf16.mxu1 %v3657_v25  ;;  %v3747_v24 = vld [vmem:[#allocation5 + $0x614] ss:$24 sps:$4 sm:$0xff]   ;;  %v3745_v25 = vld [vmem:[#allocation5 + $0x610] ss:$24 sps:$4 sm:$0xff]  }
 0x10c   :  { %2146 = vmatprep.subr.bf16.mxu0 %v3660_v26  ;;  %2090 = vmatprep.mubr.bf16.mxu1 %v4022_v38  ;;  %v3750_v26 = vld [vmem:[#allocation5 + $0x644] ss:$24 sps:$4 sm:$0xff]  }
 0x10d   :  { %2176 = vmatprep.mubr.bf16.mxu0 %v4005_v54  ;;  %v3676_v54 = vld [vmem:[#allocation5 + $0x3d0] ss:$24 sps:$4 sm:$0xff]  }
 0x10e   :  { %2061 = vmatpush1.bf16.msra.mxu1 %v3655_v27  ;;  %v3748_v27 = vld [vmem:[#allocation5 + $0x640] ss:$24 sps:$4 sm:$0xff]  }
 0x10f   :  { %2147 = vmatpush1.bf16.msra.mxu0 %v3658_v28  ;;  %2062 = vmatprep.subr.bf16.mxu1 %v3663_v29  ;;  %v3753_v28 = vld [vmem:[#allocation5 + $0x674] ss:$24 sps:$4 sm:$0xff]   ;;  %v3751_v29 = vld [vmem:[#allocation5 + $0x670] ss:$24 sps:$4 sm:$0xff]  }
 0x110   :  { %2148 = vmatprep.subr.bf16.mxu0 %v3666_v30  ;;  %v3756_v30 = vld [vmem:[#allocation5 + $0x6a4] ss:$24 sps:$4 sm:$0xff]  }
 0x112   :  { %2063 = vmatpush1.bf16.msra.mxu1 %v3661_v31  ;;  %v3754_v31 = vld [vmem:[#allocation5 + $0x6a0] ss:$24 sps:$4 sm:$0xff]  }
 0x113   :  { %2149 = vmatpush1.bf16.msra.mxu0 %v3664_v32  ;;  %2064 = vmatprep.subr.bf16.mxu1 %v3669_v33  ;;  %v3759_v32 = vld [vmem:[#allocation5 + $0x6d4] ss:$24 sps:$4 sm:$0xff]   ;;  %v3757_v33 = vld [vmem:[#allocation5 + $0x6d0] ss:$24 sps:$4 sm:$0xff]  }
 0x114   :  { %2150 = vmatprep.subr.bf16.mxu0 %v3672_v10  ;;  %v3762_v10 = vld [vmem:[#allocation5 + $0x704] ss:$24 sps:$4 sm:$0xff]  }
 0x116   :  { %2065 = vmatpush1.bf16.msra.mxu1 %v3667_v34  ;;  %v3765_v34 = vld [vmem:[#allocation5 + $0x734] ss:$24 sps:$4 sm:$0xff]  }
 0x117   :  { %2151 = vmatpush1.bf16.msra.mxu0 %v3670_v53  ;;  %2066 = vmatprep.subr.bf16.mxu1 %v3675_v35  ;;  %v3763_v35 = vld [vmem:[#allocation5 + $0x730] ss:$24 sps:$4 sm:$0xff]  }
 0x118   :  { %2152 = vmatprep.subr.bf16.mxu0 %v3678_v36 }
 0x11a   :  { %2067 = vmatpush1.bf16.msra.mxu1 %v3673_v37  ;;  %v3768_v37 = vld [vmem:[#allocation5 + $0x764] ss:$24 sps:$4 sm:$0xff]  }
 0x11b   :  { %2153 = vmatpush1.bf16.msra.mxu0 %v3676_v54  ;;  %2068 = vmatprep.subr.bf16.mxu1 %v3681_v39  ;;  %v3766_v39 = vld [vmem:[#allocation5 + $0x760] ss:$24 sps:$4 sm:$0xff]  }
 0x11c   :  { %2154 = vmatprep.subr.bf16.mxu0 %v3684_v40  ;;  %v3771_v40 = vld [vmem:[#allocation5 + $0x794] ss:$24 sps:$4 sm:$0xff]  }
 0x11e   :  { %2069 = vmatpush1.bf16.msra.mxu1 %v3679_v41  ;;  %v3769_v41 = vld [vmem:[#allocation5 + $0x790] ss:$24 sps:$4 sm:$0xff]  }
 0x11f   :  { %2155 = vmatpush1.bf16.msra.mxu0 %v3682_v42  ;;  %2070 = vmatprep.subr.bf16.mxu1 %v3687_v43  ;;  %v3774_v42 = vld [vmem:[#allocation5 + $0x7c4] ss:$24 sps:$4 sm:$0xff]   ;;  %v3772_v43 = vld [vmem:[#allocation5 + $0x7c0] ss:$24 sps:$4 sm:$0xff]  }
 0x120   :  { %2156 = vmatprep.subr.bf16.mxu0 %v3690_v44  ;;  %v3777_v44 = vld [vmem:[#allocation5 + $0x7f4] ss:$24 sps:$4 sm:$0xff]  }
 0x122   :  { %2071 = vmatpush1.bf16.msra.mxu1 %v3685_v45  ;;  %v3775_v45 = vld [vmem:[#allocation5 + $0x7f0] ss:$24 sps:$4 sm:$0xff]  }
 0x123   :  { %2157 = vmatpush1.bf16.msra.mxu0 %v3688_v46  ;;  %2072 = vmatprep.subr.bf16.mxu1 %v3693_v47  ;;  %v3780_v46 = vld [vmem:[#allocation5 + $0x824] ss:$24 sps:$4 sm:$0xff]   ;;  %v3778_v47 = vld [vmem:[#allocation5 + $0x820] ss:$24 sps:$4 sm:$0xff]  }
 0x124   :  { %2158 = vmatprep.subr.bf16.mxu0 %v3696_v48  ;;  %v3783_v48 = vld [vmem:[#allocation5 + $0x854] ss:$24 sps:$4 sm:$0xff]  }
 0x126   :  { %2073 = vmatpush1.bf16.msra.mxu1 %v3691_v49  ;;  %v3781_v49 = vld [vmem:[#allocation5 + $0x850] ss:$24 sps:$4 sm:$0xff]  }
 0x127   :  { %2159 = vmatpush1.bf16.msra.mxu0 %v3694_v50  ;;  %2074 = vmatprep.subr.bf16.mxu1 %v3699_v51  ;;  %v3786_v50 = vld [vmem:[#allocation5 + $0x884] ss:$24 sps:$4 sm:$0xff]   ;;  %v3784_v51 = vld [vmem:[#allocation5 + $0x880] ss:$24 sps:$4 sm:$0xff]  }
 0x128   :  { %2160 = vmatprep.subr.bf16.mxu0 %v3702_v52  ;;  %v3789_v52 = vld [vmem:[#allocation5 + $0x8b4] ss:$24 sps:$4 sm:$0xff]  }
 0x12a   :  { %2075 = vmatpush1.bf16.msra.mxu1 %v3697_v55  ;;  %v3787_v55 = vld [vmem:[#allocation5 + $0x8b0] ss:$24 sps:$4 sm:$0xff]  }
 0x12b   :  { %2161 = vmatpush1.bf16.msra.mxu0 %v3700_v56  ;;  %2076 = vmatprep.subr.bf16.mxu1 %v3705_v57  ;;  %v3792_v56 = vld [vmem:[#allocation5 + $0x8e4] ss:$24 sps:$4 sm:$0xff]   ;;  %v3790_v57 = vld [vmem:[#allocation5 + $0x8e0] ss:$24 sps:$4 sm:$0xff]  }
 0x12c   :  { %2162 = vmatprep.subr.bf16.mxu0 %v3708_v58  ;;  %v4047_v58 = vld [vmem:[#allocation3] sm:$0xff] }
 0x12d   :  { %4760 = vst [vmem:[#allocation13_spill] sm:$0xff] %v4047_v58 }
 0x12e   :  { %2077 = vmatpush1.bf16.msra.mxu1 %v3703_v59  ;;  %v4049_v59 = vld [vmem:[#allocation3 + $0x18] sm:$0xff] }
 0x12f   :  { %2163 = vmatpush1.bf16.msra.mxu0 %v3706_v60  ;;  %2078 = vmatprep.subr.bf16.mxu1 %v3711_v61  ;;  %4761 = vst [vmem:[#allocation14_spill] sm:$0xff] %v4049_v59  ;;  %v4051_v60 = vld [vmem:[#allocation3 + $0x30] sm:$0xff]  ;;  %v3801_v61 = vld [vmem:[#allocation3 + $0x60] sm:$0xff] }
 0x130   :  { %2164 = vmatprep.subr.bf16.mxu0 %v3714_v62  ;;  %4762 = vst [vmem:[#allocation15_spill] sm:$0xff] %v4051_v60  ;;  %v4053_v62 = vunpack.c.l.bf16 %v3801_v61 }
 0x132   :  { %2079 = vmatpush1.bf16.msra.mxu1 %v3709_v63  ;;  %v4055_v63 = vunpack.c.h.bf16 %v3801_v61 }
 0x133   :  { %2165 = vmatpush1.bf16.msra.mxu0 %v3712_v0  ;;  %2080 = vmatprep.subr.bf16.mxu1 %v3717_v1  ;;  %v3802_v0 = vld [vmem:[#allocation3 + $0x78] sm:$0xff] }
 0x134   :  { %2166 = vmatprep.subr.bf16.mxu0 %v3720_v2  ;;  %v4057_v1 = vunpack.c.l.bf16 %v3802_v0  ;;  %v4059_v2 = vunpack.c.h.bf16 %v3802_v0 }
 0x136   :  { %2081 = vmatpush1.bf16.msra.mxu1 %v3715_v3  ;;  %v4061_v3 = vld [vmem:[#allocation3 + $0x48] sm:$0xff] }
 0x137   :  { %2167 = vmatpush1.bf16.msra.mxu0 %v3718_v4  ;;  %2082 = vmatprep.subr.bf16.mxu1 %v3723_v5  ;;  %4763 = vst [vmem:[#allocation16_spill] sm:$0xff] %v4061_v3  ;;  %v3803_v4 = vld [vmem:[#allocation3 + $0x68] sm:$0xff] }
 0x138   :  { %2168 = vmatprep.subr.bf16.mxu0 %v3726_v6  ;;  %v4065_v5 = vunpack.c.h.bf16 %v3803_v4  ;;  %v3804_v6 = vld [vmem:[#allocation3 + $0x80] sm:$0xff] }
 0x13a   :  { %2083 = vmatpush1.bf16.msra.mxu1 %v3721_v7  ;;  %v4067_v7 = vunpack.c.l.bf16 %v3804_v6 }
 0x13b   :  { %2169 = vmatpush1.bf16.msra.mxu0 %v3724_v8  ;;  %2084 = vmatprep.subr.bf16.mxu1 %v3729_v9  ;;  %v4704_v9 = vunpack.c.l.bf16 %v4047_v58 }
 0x13c   :  { %2170 = vmatprep.subr.bf16.mxu0 %v3732_v12  ;;  %4764 = vst [vmem:[#allocation17_spill] sm:$0xff] %v4067_v7 }
 0x13e   :  { %2085 = vmatpush1.bf16.msra.mxu1 %v3727_v13 }
 0x13f   :  { %2171 = vmatpush1.bf16.msra.mxu0 %v3730_v14  ;;  %2086 = vmatprep.subr.bf16.mxu1 %v3735_v15  ;;  %v4703_v14 = vunpack.c.h.bf16 %v4047_v58  ;;  %v4702_v15 = vunpack.c.l.bf16 %v4049_v59 }
 0x140   :  { %2172 = vmatprep.subr.bf16.mxu0 %v3738_v16  ;;  %v4700_v16 = vunpack.c.l.bf16 %v4051_v60 }
 0x142   :  { %2087 = vmatpush1.bf16.msra.mxu1 %v3733_v18 }
 0x143   :  { %2173 = vmatpush1.bf16.msra.mxu0 %v3736_v19  ;;  %2088 = vmatprep.subr.bf16.mxu1 %v3741_v20  ;;  %v4701_v20 = vunpack.c.h.bf16 %v4049_v59 }
 0x144   :  { %2174 = vmatprep.subr.bf16.mxu0 %v3744_v21  ;;  %v4699_v21 = vunpack.c.h.bf16 %v4051_v60 }
 0x146   :  { %2089 = vmatpush1.bf16.msra.mxu1 %v3739_v22  ;;  %v4698_v22 = vunpack.c.l.bf16 %v4061_v3 }
 0x147   :  { %2175 = vmatpush1.bf16.msra.mxu0 %v3742_v23  ;;  %v4081_v23 = vunpack.c.h.bf16 %v3804_v6  ;;  %v4144_v6 = vld [vmem:[#allocation3 + $0xd8] sm:$0xff] }
 0x148   :  { %2187 = vmatprep.subr.bf16.mxu0 %v3747_v24  ;;  %v3805_v24 = vld [vmem:[#allocation3 + $0x70] sm:$0xff]  ;;  %4772 = vst [vmem:[#allocation25_spill] sm:$0xff] %v4144_v6 }
 0x149   :  { %2091 = vmatmul.mubr.bf16.vlgmr.msra.gmra.mrb[4].mxu1 %v4027_v17  ;;  %4765 = vst [vmem:[#allocation18_spill] sm:$0xff] %v4081_v23 }
 0x14a   :  { %2177 = vmatmul.mubr.bf16.vlgmr.msra.gmra.mrb[4].mxu0 %v4011_v11  ;;  %v3760_v11 = vld [vmem:[#allocation5 + $0x700] ss:$24 sps:$4 sm:$0xff]  }
 0x14b   :  { %2188 = vmatpush1.bf16.msra.mxu0 %v3745_v25  ;;  %2219 = vmatprep.mubr.bf16.mxu0 %v4022_v38  ;;  %v4083_v25 = vunpack.c.l.bf16 %v3805_v24 }
 0x14c   :  { %2189 = vmatprep.subr.bf16.mxu0 %v3750_v26 }
 0x14d   :  { %4766 = vst [vmem:[#allocation19_spill] sm:$0xff] %v4083_v25 }
 0x14f   :  { %2190 = vmatpush1.bf16.msra.mxu0 %v3748_v27 }
 0x150   :  { %2191 = vmatprep.subr.bf16.mxu0 %v3753_v28  ;;  %v4697_v28 = vunpack.c.h.bf16 %v4061_v3 }
 0x153   :  { %2192 = vmatpush1.bf16.msra.mxu0 %v3751_v29  ;;  %v4089_v29 = vunpack.c.h.bf16 %v3805_v24 }
 0x154   :  { %2193 = vmatprep.subr.bf16.mxu0 %v3756_v30  ;;  %v3806_v30 = vld [vmem:[#allocation3 + $0x88] sm:$0xff] }
 0x155   :  { %4767 = vst [vmem:[#allocation20_spill] sm:$0xff] %v4089_v29 }
 0x157   :  { %2194 = vmatpush1.bf16.msra.mxu0 %v3754_v31  ;;  %v4091_v31 = vunpack.c.l.bf16 %v3806_v30 }
 0x158   :  { %2195 = vmatprep.subr.bf16.mxu0 %v3759_v32 }
 0x159   :  { %4768 = vst [vmem:[#allocation21_spill] sm:$0xff] %v4091_v31 }
 0x15b   :  { %2196 = vmatpush1.bf16.msra.mxu0 %v3757_v33 }
 0x15c   :  { %2197 = vmatprep.subr.bf16.mxu0 %v3762_v10  ;;  %v1877_v53 = vpop.f32.mrb[0].mxu1  ;;  %v4099_v10 = vld [vmem:[#allocation3 + $0x90] sm:$0xff] }
 0x15d   :  { %v4040_v38 = vpop.f32.mrb[1].mxu1  ;;  %4769 = vst [vmem:[#allocation22_spill] sm:$0xff] %v4099_v10 }
 0x15e   :  { %v4042_v36 = vpop.f32.mrb[2].mxu1 }
 0x15f   :  { %2198 = vmatpush1.bf16.msra.mxu0 %v3760_v11  ;;  %v4044_v54 = vpop.f32.mrb[3].mxu1  ;;  %v4101_v11 = vunpack.c.h.bf16 %v3806_v30 }
 0x160   :  { %2199 = vmatprep.subr.bf16.mxu0 %v3765_v34  ;;  %v2276_v34 = vlaneseq }
 0x163   :  { %2200 = vmatpush1.bf16.msra.mxu0 %v3763_v35 }
 0x164   :  { %2201 = vmatprep.subr.bf16.mxu0 %v3768_v37  ;;  %v2698_v37 = vld [vmem:[#allocation7 + $0x1] ss:$8 sm:$0xf] }
 0x167   :  { %2202 = vmatpush1.bf16.msra.mxu0 %v3766_v39 }
 0x168   :  { %2203 = vmatprep.subr.bf16.mxu0 %v3771_v40 }
 0x16b   :  { %2204 = vmatpush1.bf16.msra.mxu0 %v3769_v41 }
 0x16c   :  { %2205 = vmatprep.subr.bf16.mxu0 %v3774_v42  ;;  %v2277_v42 = vshrl.u32 %v2276_v34, 7 }
 0x16e   :  { %v4138_v61 = vsub.s32 1, %v2277_v42  ;;  %v4140_v0 = vsub.s32 2, %v2277_v42 }
 0x16f   :  { %2206 = vmatpush1.bf16.msra.mxu0 %v3772_v43  ;;  %v2699_v43 = vld [vmem:[#allocation7 + $0x1] ss:$8 sm:$0x30] }
 0x170   :  { %2207 = vmatprep.subr.bf16.mxu0 %v3777_v44 }
 0x173   :  { %2208 = vmatpush1.bf16.msra.mxu0 %v3775_v45 }
 0x174   :  { %2209 = vmatprep.subr.bf16.mxu0 %v3780_v46 }
 0x177   :  { %2210 = vmatpush1.bf16.msra.mxu0 %v3778_v47  ;;  %v4127_v47 = vld [vmem:[#allocation3 + $0xa8] sm:$0xff] }
 0x178   :  { %2211 = vmatprep.subr.bf16.mxu0 %v3783_v48  ;;  %4770 = vst [vmem:[#allocation23_spill] sm:$0xff] %v4127_v47  ;;  %v4129_v48 = vld [vmem:[#allocation3 + $0xc0] sm:$0xff] }
 0x179   :  { %4771 = vst [vmem:[#allocation24_spill] sm:$0xff] %v4129_v48 }
 0x17b   :  { %2212 = vmatpush1.bf16.msra.mxu0 %v3781_v49 }
 0x17c   :  { %2213 = vmatprep.subr.bf16.mxu0 %v3786_v50  ;;  %v2765_v50 = vld [vmem:[#allocation7 + $0x2] ss:$8 sm:$0xf] }
 0x17f   :  { %2214 = vmatpush1.bf16.msra.mxu0 %v3784_v51  ;;  %v2766_v51 = vld [vmem:[#allocation7 + $0x2] ss:$8 sm:$0x30] }
 0x180   :  { %2215 = vmatprep.subr.bf16.mxu0 %v3789_v52 }
 0x183   :  { %2216 = vmatpush1.bf16.msra.mxu0 %v3787_v55 }
 0x184   :  { %2217 = vmatprep.subr.bf16.mxu0 %v3792_v56 }
 0x187   :  { %2218 = vmatpush1.bf16.msra.mxu0 %v3790_v57  ;;  %v4136_v57 = vsub.s32 0, %v2277_v42 }
 0x18a   :  { %2220 = vmatmul.mubr.bf16.vlgmr.msra.gmra.mrb[4].mxu0 %v4027_v17  ;;  %v4063_v17 = vunpack.c.l.bf16 %v3803_v4  ;;  %v4142_v4 = vsub.s32 3, %v2277_v42 }
 0x19d   :  { %v1963_v8 = vpop.f32.mrb[0].mxu0 }
 0x19e   :  { %v4070_v12 = vadd.f32 %v1963_v8, %v1877_v53  ;;  %v1965_v13 = vpop.f32.mrb[1].mxu0  ;;  %v2631_v53 = vld [vmem:[#allocation7] ss:$8 sm:$0xf]  ;;  %v4146_v8 = vsub.s32 4, %v2277_v42 }
 0x19f   :  { %v4076_v18 = vadd.f32 %v1965_v13, %v4040_v38  ;;  %v1967_v19 = vpop.f32.mrb[2].mxu0  ;;  %v4148_v13 = vsub.s32 5, %v2277_v42 }
 0x1a0   :  { %v4086_v26 = vadd.f32 %v1967_v19, %v4042_v36  ;;  %v1969_v27 = vpop.f32.mrb[3].mxu0  ;;  %v2249_v33 = vmul.f32 %v4070_v12, %v4704_v9  ;;  %v2632_v36 = vld [vmem:[#allocation7] ss:$8 sm:$0x30]  ;;  %v2351_v39 = vmul.f32 %v4070_v12, %v4700_v16  ;;  %v2700_v19 = vor.u32 %v2699_v43, %v2698_v37 }
 0x1a1   :  { %v4094_v32 = vadd.f32 %v1969_v27, %v4044_v54  ;;  %v2250_v38 = vmul.f32 %v4076_v18, %v4703_v14  ;;  %v2352_v40 = vmul.f32 %v4076_v18, %v4699_v21  ;;  %v2633_v49 = vor.u32 %v2632_v36, %v2631_v53 }
 0x1a2   :  { %v2255_v35 = vmul.f32 %v4086_v26, %v4702_v15  ;;  %v2357_v41 = vmul.f32 %v4086_v26, %v4698_v22  ;;  %v2705_v43 = vrot.slane %v2700_v19, %v4136_v57  ;;  %v2713_v16 = vrot.slane %v2700_v19, %v4140_v0 }
 0x1a3   :  { %v2256_v54 = vmul.f32 %v4094_v32, %v4701_v20  ;;  %v4121_v44 = vadd.f32 %v2250_v38, %v2249_v33  ;;  %v2358_v45 = vmul.f32 %v4094_v32, %v4697_v28  ;;  %v4133_v55 = vadd.f32 %v2352_v40, %v2351_v39 }
 0x1a4   :  { %v2638_v53 = vrot.slane %v2633_v49, %v4136_v57  ;;  %v2642_v38 = vrot.slane %v2633_v49, %v4138_v61  ;;  %v2650_v37 = vrot.slane %v2633_v49, %v4142_v4  ;;  %v2654_v39 = vrot.slane %v2633_v49, %v4146_v8 }
 0x1a5   :  { %v4131_v52 = vadd.f32 %v2256_v54, %v2255_v35  ;;  %v4150_v24 = vadd.f32 %v2358_v45, %v2357_v41  ;;  %v2767_v35 = vor.u32 %v2766_v51, %v2765_v50  ;;  %v2646_v54 = vrot.slane %v2633_v49, %v4140_v0 }
 0x1a6   :  { %v2658_v40 = vrot.slane %v2633_v49, %v4148_v13  ;;  %v2665_v41 = vmul.f32 %v2638_v53, %v4053_v62  ;;  %v2666_v42 = vmul.f32 %v2642_v38, %v4055_v63  ;;  %v2709_v45 = vrot.slane %v2700_v19, %v4138_v61 }
 0x1a7   :  { %4773 = vst [vmem:[#allocation26_spill] sm:$0xff] %v4150_v24  ;;  %v2667_v50 = vmul.f32 %v2646_v54, %v4063_v17  ;;  %v2668_v51 = vmul.f32 %v2650_v37, %v4065_v5  ;;  %v2669_v28 = vmul.f32 %v2654_v39, %v4083_v25  ;;  %v2717_v49 = vrot.slane %v2700_v19, %v4142_v4 }
 0x1a8   :  { %v2670_v22 = vmul.f32 %v2658_v40, %v4089_v29  ;;  %v2677_v21 = vadd.f32 %v2666_v42, %v2665_v41  ;;  %v2721_v20 = vrot.slane %v2700_v19, %v4146_v8  ;;  %v2725_v15 = vrot.slane %v2700_v19, %v4148_v13 }
 0x1a9   :  { %v2732_v14 = vmul.f32 %v2705_v43, %v4053_v62  ;;  %v2733_v9 = vmul.f32 %v2709_v45, %v4055_v63  ;;  %v2671_v36 = vmul.f32 %v2638_v53, %v4057_v1  ;;  %v2734_v33 = vmul.f32 %v2713_v16, %v4063_v17 }
 0x1aa   :  { %v2678_v34 = vadd.f32 %v2677_v21, %v2667_v50  ;;  %v2735_v30 = vmul.f32 %v2717_v49, %v4065_v5  ;;  %v2736_v41 = vmul.f32 %v2721_v20, %v4083_v25  ;;  %v2737_v42 = vmul.f32 %v2725_v15, %v4089_v29 }
 0x1ab   :  { %v2744_v27 = vadd.f32 %v2733_v9, %v2732_v14  ;;  %v2672_v56 = vmul.f32 %v2642_v38, %v4059_v2  ;;  %v2673_v19 = vmul.f32 %v2646_v54, %v4067_v7  ;;  %v2674_v3 = vmul.f32 %v2650_v37, %v4081_v23 }
 0x1ac   :  { %v2679_v46 = vadd.f32 %v2678_v34, %v2668_v51  ;;  %v2675_v60 = vmul.f32 %v2654_v39, %v4091_v31  ;;  %v2676_v21 = vmul.f32 %v2658_v40, %v4101_v11  ;;  %v2738_v59 = vmul.f32 %v2705_v43, %v4057_v1 }
 0x1ad   :  { %v2745_v53 = vadd.f32 %v2744_v27, %v2734_v33  ;;  %v2684_v50 = vadd.f32 %v2672_v56, %v2671_v36  ;;  %v2739_v58 = vmul.f32 %v2709_v45, %v4059_v2  ;;  %v2740_v9 = vmul.f32 %v2713_v16, %v4067_v7  ;;  %v2832_v45 = vld [vmem:[#allocation7 + $0x3] ss:$8 sm:$0xf] }
 0x1ae   :  { %v2680_v24 = vadd.f32 %v2679_v46, %v2669_v28  ;;  %v2741_v14 = vmul.f32 %v2717_v49, %v4081_v23  ;;  %v2742_v38 = vmul.f32 %v2721_v20, %v4091_v31  ;;  %v2743_v37 = vmul.f32 %v2725_v15, %v4101_v11  ;;  %v2833_v49 = vld [vmem:[#allocation7 + $0x3] ss:$8 sm:$0x30] }
 0x1af   :  { %v2746_v34 = vadd.f32 %v2745_v53, %v2735_v30  ;;  %v2685_v54 = vadd.f32 %v2684_v50, %v2673_v19  ;;  %v2751_v39 = vadd.f32 %v2739_v58, %v2738_v59  ;;  %v2772_v27 = vrot.slane %v2767_v35, %v4136_v57  ;;  %v2899_v50 = vld [vmem:[#allocation7 + $0x4] ss:$8 sm:$0xf] }
 0x1b0   :  { %v2681_v51 = vadd.f32 %v2680_v24, %v2670_v22  ;;  %v2776_v56 = vrot.slane %v2767_v35, %v4138_v61  ;;  %v2780_v33 = vrot.slane %v2767_v35, %v4140_v0  ;;  %v2784_v16 = vrot.slane %v2767_v35, %v4142_v4 }
 0x1b1   :  { %v2747_v36 = vadd.f32 %v2746_v34, %v2736_v41  ;;  %v2686_v28 = vadd.f32 %v2685_v54, %v2674_v3  ;;  %v2752_v46 = vadd.f32 %v2751_v39, %v2740_v9  ;;  %v2788_v20 = vrot.slane %v2767_v35, %v4146_v8  ;;  %v2900_v9 = vld [vmem:[#allocation7 + $0x4] ss:$8 sm:$0x30] }
 0x1b2   :  { %2682 = vadd.xlane.f32.xlu0 %v2681_v51  ;;  %v2792_v30 = vrot.slane %v2767_v35, %v4148_v13  ;;  %v2799_v15 = vmul.f32 %v2772_v27, %v4053_v62  ;;  %v2800_v58 = vmul.f32 %v2776_v56, %v4055_v63  ;;  %v2801_v40 = vmul.f32 %v2780_v33, %v4063_v17 }
 0x1b3   :  { %v2748_v59 = vadd.f32 %v2747_v36, %v2737_v42  ;;  %v2687_v22 = vadd.f32 %v2686_v28, %v2675_v60  ;;  %v2753_v24 = vadd.f32 %v2752_v46, %v2741_v14  ;;  %v2802_v43 = vmul.f32 %v2784_v16, %v4065_v5 }
 0x1b4   :  { %v2811_v3 = vadd.f32 %v2800_v58, %v2799_v15  ;;  %v4205_v41 = vmul.f32 %v4070_v12, %v4053_v62  ;;  %v4713_v35 = vunpack.c.h.bf16 %v4144_v6  ;;  %v2805_v42 = vmul.f32 %v2772_v27, %v4057_v1 }
 0x1b5   :  { %2749 = vadd.xlane.f32.xlu1 %v2748_v59  ;;  %v2688_v19 = vadd.f32 %v2687_v22, %v2676_v21  ;;  %v2754_v53 = vadd.f32 %v2753_v24, %v2742_v38  ;;  %v2806_v60 = vmul.f32 %v2776_v56, %v4059_v2  ;;  %v2803_v14 = vmul.f32 %v2788_v20, %v4083_v25 }
 0x1b6   :  { %v2804_v34 = vmul.f32 %v2792_v30, %v4089_v29  ;;  %v2812_v54 = vadd.f32 %v2811_v3, %v2801_v40  ;;  %v2807_v39 = vmul.f32 %v2780_v33, %v4067_v7  ;;  %v2808_v36 = vmul.f32 %v2784_v16, %v4081_v23 }
 0x1b7   :  { %2689 = vadd.xlane.f32.xlu0 %v2688_v19  ;;  %v2755_v51 = vadd.f32 %v2754_v53, %v2743_v37  ;;  %v2818_v28 = vadd.f32 %v2806_v60, %v2805_v42  ;;  %v2834_v21 = vor.u32 %v2833_v49, %v2832_v45  ;;  %v2809_v27 = vmul.f32 %v2788_v20, %v4091_v31 }
 0x1b8   :  { %v2813_v38 = vadd.f32 %v2812_v54, %v2802_v43  ;;  %v2810_v56 = vmul.f32 %v2792_v30, %v4101_v11  ;;  %v2901_v46 = vor.u32 %v2900_v9, %v2899_v50  ;;  %v2416_v19 = vmul.f32 %v4076_v18, %v4055_v63 }
 0x1b9   :  { %2756 = vadd.xlane.f32.xlu1 %v2755_v51  ;;  %v2819_v15 = vadd.f32 %v2818_v28, %v2807_v39  ;;  %v2839_v58 = vrot.slane %v2834_v21, %v4136_v57  ;;  %v2843_v59 = vrot.slane %v2834_v21, %v4138_v61  ;;  %v2847_v33 = vrot.slane %v2834_v21, %v4140_v0 }
 0x1ba   :  { %v2814_v22 = vadd.f32 %v2813_v38, %v2803_v14  ;;  %v2851_v37 = vrot.slane %v2834_v21, %v4142_v4  ;;  %v2855_v16 = vrot.slane %v2834_v21, %v4146_v8  ;;  %v2859_v24 = vrot.slane %v2834_v21, %v4148_v13 }
 0x1bb   :  { %v2820_v40 = vadd.f32 %v2819_v15, %v2808_v36  ;;  %v2866_v20 = vmul.f32 %v2839_v58, %v4053_v62  ;;  %v2867_v30 = vmul.f32 %v2843_v59, %v4055_v63  ;;  %v2868_v43 = vmul.f32 %v2847_v33, %v4063_v17 }
 0x1bc   :  { %v2815_v3 = vadd.f32 %v2814_v22, %v2804_v34  ;;  %v2869_v45 = vmul.f32 %v2851_v37, %v4065_v5  ;;  %v2870_v49 = vmul.f32 %v2855_v16, %v4083_v25  ;;  %v2872_v60 = vmul.f32 %v2839_v58, %v4057_v1 }
 0x1bd   :  { %v2821_v53 = vadd.f32 %v2820_v40, %v2809_v27  ;;  %v2878_v42 = vadd.f32 %v2867_v30, %v2866_v20  ;;  %v2873_v50 = vmul.f32 %v2843_v59, %v4059_v2  ;;  %v2871_v9 = vmul.f32 %v2859_v24, %v4089_v29 }
 0x1be   :  { %2816 = vadd.xlane.f32.xlu0 %v2815_v3  ;;  %v2874_v14 = vmul.f32 %v2847_v33, %v4067_v7  ;;  %v2875_v34 = vmul.f32 %v2851_v37, %v4081_v23  ;;  %v2876_v54 = vmul.f32 %v2855_v16, %v4091_v31  ;;  %v2906_v28 = vrot.slane %v2901_v46, %v4136_v57 }
 0x1bf   :  { %v2822_v39 = vadd.f32 %v2821_v53, %v2810_v56  ;;  %v2879_v51 = vadd.f32 %v2878_v42, %v2868_v43  ;;  %v2885_v36 = vadd.f32 %v2873_v50, %v2872_v60  ;;  %v2910_v21 = vrot.slane %v2901_v46, %v4138_v61 }
 0x1c0   :  { %v2914_v38 = vrot.slane %v2901_v46, %v4140_v0  ;;  %v2918_v27 = vrot.slane %v2901_v46, %v4142_v4  ;;  %v2922_v15 = vrot.slane %v2901_v46, %v4146_v8  ;;  %v2926_v33 = vrot.slane %v2901_v46, %v4148_v13 }
 0x1c1   :  { %2823 = vadd.xlane.f32.xlu1 %v2822_v39  ;;  %v2880_v58 = vadd.f32 %v2879_v51, %v2869_v45  ;;  %v2886_v59 = vadd.f32 %v2885_v36, %v2874_v14  ;;  %v2933_v22 = vmul.f32 %v2906_v28, %v4053_v62  ;;  %v2877_v56 = vmul.f32 %v2859_v24, %v4101_v11 }
 0x1c2   :  { %v2934_v37 = vmul.f32 %v2910_v21, %v4055_v63  ;;  %v2935_v16 = vmul.f32 %v2914_v38, %v4063_v17  ;;  %v2421_v40 = vmul.f32 %v4086_v26, %v4057_v1  ;;  %v2936_v43 = vmul.f32 %v2918_v27, %v4065_v5 }
 0x1c3   :  { %v2881_v20 = vadd.f32 %v2880_v58, %v2870_v49  ;;  %v2887_v30 = vadd.f32 %v2886_v59, %v2875_v34  ;;  %v2939_v3 = vmul.f32 %v2906_v28, %v4057_v1  ;;  %v2937_v45 = vmul.f32 %v2922_v15, %v4083_v25 }
 0x1c4   :  { %v2945_v46 = vadd.f32 %v2934_v37, %v2933_v22  ;;  %v2940_v53 = vmul.f32 %v2910_v21, %v4059_v2  ;;  %v2941_v24 = vmul.f32 %v2914_v38, %v4067_v7  ;;  %v2938_v50 = vmul.f32 %v2926_v33, %v4089_v29 }
 0x1c5   :  { %v2882_v42 = vadd.f32 %v2881_v20, %v2871_v9  ;;  %v2888_v60 = vadd.f32 %v2887_v30, %v2876_v54  ;;  %v2942_v14 = vmul.f32 %v2918_v27, %v4081_v23  ;;  %v4255_v34 = vadd.f32 %v2416_v19, %v4205_v41 }
 0x1c6   :  { %v2946_v39 = vadd.f32 %v2945_v46, %v2935_v16  ;;  %v2952_v49 = vadd.f32 %v2940_v53, %v2939_v3  ;;  %v2422_v51 = vmul.f32 %v4094_v32, %v4059_v2  ;;  %v2943_v28 = vmul.f32 %v2922_v15, %v4091_v31 }
 0x1c7   :  { %2883 = vadd.xlane.f32.xlu0 %v2882_v42  ;;  %v2889_v36 = vadd.f32 %v2888_v60, %v2877_v56  ;;  %v4774_v21 = vunpack.c.l.bf16 %v4099_v10  ;;  %v4775_v54 = vunpack.c.h.bf16 %v4099_v10  ;;  %v4776_v41 = vunpack.c.l.bf16 %v4127_v47 }
 0x1c8   :  { %v2947_v27 = vadd.f32 %v2946_v39, %v2936_v43  ;;  %v2953_v58 = vadd.f32 %v2952_v49, %v2941_v24  ;;  %v4266_v59 = vadd.f32 %v2422_v51, %v2421_v40  ;;  %v2944_v22 = vmul.f32 %v2926_v33, %v4101_v11  ;;  %v4301_v49 = vld [vmem:[#allocation3 + $0xc8] sm:$0xff]  ;;  %v4303_v51 = vld [vmem:[#allocation3 + $0x20] sm:$0xff] }
 0x1c9   :  { %v2486_v9 = vmul.f32 %v4070_v12, %v4774_v21  ;;  %v2487_v38 = vmul.f32 %v4076_v18, %v4775_v54  ;;  %v2492_v19 = vmul.f32 %v4086_v26, %v4776_v41  ;;  %2890 = vadd.xlane.f32.xlu1 %v2889_v36  ;;  %v4777_v56 = vunpack.c.h.bf16 %v4127_v47  ;;  %4782 = vst [vmem:[#allocation28_spill] sm:$0xff] %v4301_v49  ;;  %v4309_v36 = vld [vmem:[#allocation3 + $0xe0] sm:$0xff] }
 0x1ca   :  { %v4778_v16 = vunpack.c.l.bf16 %v4129_v48  ;;  %v2948_v30 = vadd.f32 %v2947_v27, %v2937_v45  ;;  %v2954_v40 = vadd.f32 %v2953_v58, %v2942_v14  ;;  %v4779_v43 = vunpack.c.h.bf16 %v4129_v48  ;;  %v4297_v14 = vld [vmem:[#allocation3 + $0x38] sm:$0xff]  ;;  %4784 = vst [vmem:[#allocation30_spill] sm:$0xff] %v4309_v36 }
 0x1cb   :  { %v4272_v15 = vadd.f32 %v2487_v38, %v2486_v9  ;;  %v2493_v37 = vmul.f32 %v4094_v32, %v4777_v56  ;;  %v4780_v46 = vunpack.c.l.bf16 %v4144_v6  ;;  %v2564_v24 = vmul.f32 %v4094_v32, %v4713_v35  ;;  %v4305_v32 = vld [vmem:[#allocation3 + $0x50] sm:$0xff] }
 0x1cc   :  { %v2557_v20 = vmul.f32 %v4070_v12, %v4778_v16  ;;  %v2558_v3 = vmul.f32 %v4076_v18, %v4779_v43  ;;  %v2949_v42 = vadd.f32 %v2948_v30, %v2938_v50  ;;  %v2955_v60 = vadd.f32 %v2954_v40, %v2943_v28  ;;  %v4295_v18 = vld [vmem:[#allocation3 + $0x8] sm:$0xff]  ;;  %v4307_v50 = vld [vmem:[#allocation3 + $0xb0] sm:$0xff] }
 0x1cd   :  { %v2563_v33 = vmul.f32 %v4086_v26, %v4780_v46  ;;  %v4286_v53 = vadd.f32 %v2493_v37, %v2492_v19  ;;  %v4299_v26 = vld [vmem:[#allocation3 + $0x98] sm:$0xff]  ;;  %4783 = vst [vmem:[#allocation29_spill] sm:$0xff] %v4307_v50  ;;  %v4714_v28 = vunpack.c.l.bf16 %v4295_v18  ;;  %v4715_v21 = vunpack.c.l.bf16 %v4297_v14 }
 0x1ce   :  { %v4291_v39 = vadd.f32 %v2558_v3, %v2557_v20  ;;  %2950 = vadd.xlane.f32.xlu0 %v2949_v42  ;;  %v2956_v45 = vadd.f32 %v2955_v60, %v2944_v22  ;;  %4781 = vst [vmem:[#allocation27_spill] sm:$0xff] %v4299_v26  ;;  %v4716_v9 = vunpack.c.l.bf16 %v4299_v26  ;;  %v4717_v54 = vunpack.c.l.bf16 %v4301_v49 }
 0x1cf   :  { %v4293_v12 = vadd.f32 %v2564_v24, %v2563_v33  ;;  %v4720_v38 = vunpack.c.l.bf16 %v4303_v51  ;;  %v4721_v27 = vunpack.c.l.bf16 %v4305_v32  ;;  %v4718_v58 = vunpack.c.h.bf16 %v4295_v18 }
 0x1d0   :  { %2957 = vadd.xlane.f32.xlu1 %v2956_v45  ;;  %v4719_v41 = vunpack.c.h.bf16 %v4297_v14  ;;  %v4726_v19 = vunpack.c.l.bf16 %v4307_v50  ;;  %v4729_v22 = vunpack.c.l.bf16 %v4309_v36  ;;  %v4732_v56 = vunpack.c.h.bf16 %v4303_v51 }
 0x1d1   :  { %v4733_v37 = vunpack.c.h.bf16 %v4305_v32  ;;  %v4738_v20 = vunpack.c.h.bf16 %v4307_v50  ;;  %v4785_v6 = vunpack.c.h.bf16 %v4309_v36  ;;  %v4787_v50 = vunpack.c.h.bf16 %v4299_v26 }
 0x21c   :  { %v2092_v16 = vpop.f32.mrb[4].mxu1 }
 0x21d   :  { %v2251_v3 = vmul.f32 %v4714_v28, %v2092_v16  ;;  %v2353_v46 = vmul.f32 %v4715_v21, %v2092_v16  ;;  %v2417_v33 = vmul.f32 %v4063_v17, %v2092_v16  ;;  %v2488_v24 = vmul.f32 %v4716_v9, %v2092_v16  ;;  %v2094_v42 = vpop.f32.mrb[5].mxu1 }
 0x21e   :  { %v2559_v60 = vmul.f32 %v4717_v54, %v2092_v16  ;;  %v2096_v45 = vpop.f32.mrb[6].mxu1  ;;  %v2252_v35 = vmul.f32 %v4718_v58, %v2094_v42  ;;  %v2354_v43 = vmul.f32 %v4719_v41, %v2094_v42  ;;  %v2418_v28 = vmul.f32 %v4065_v5, %v2094_v42 }
 0x21f   :  { %v2257_v21 = vmul.f32 %v4720_v38, %v2096_v45  ;;  %v2359_v40 = vmul.f32 %v4721_v27, %v2096_v45  ;;  %v2423_v9 = vmul.f32 %v4067_v7, %v2096_v45  ;;  %v2494_v16 = vmul.f32 %v4726_v19, %v2096_v45  ;;  %v2098_v54 = vpop.f32.mrb[7].mxu1 }
 0x220   :  { %v2565_v58 = vmul.f32 %v4729_v22, %v2096_v45  ;;  %v2258_v41 = vmul.f32 %v4732_v56, %v2098_v54  ;;  %v2360_v30 = vmul.f32 %v4733_v37, %v2098_v54  ;;  %v2424_v38 = vmul.f32 %v4081_v23, %v2098_v54  ;;  %v4786_v22 = vld [vmem:[#allocation26_spill] sm:$0xff] }
 0x221   :  { %v2495_v27 = vmul.f32 %v4738_v20, %v2098_v54  ;;  %v2566_v48 = vmul.f32 %v4785_v6, %v2098_v54  ;;  %v2262_v19 = vadd.f32 %v4121_v44, %v2251_v3  ;;  %v2269_v47 = vadd.f32 %v4131_v52, %v2257_v21 }
 0x222   :  { %v2364_v45 = vadd.f32 %v4133_v55, %v2353_v46  ;;  %v2371_v10 = vadd.f32 %v4786_v22, %v2359_v40  ;;  %v2428_v56 = vadd.f32 %v4255_v34, %v2417_v33  ;;  %v2435_v37 = vadd.f32 %v4266_v59, %v2423_v9  ;;  %v4389_v9 = vld [vmem:[#allocation3 + $0xb8] sm:$0xff] }
 0x223   :  { %v2263_v7 = vadd.f32 %v2262_v19, %v2252_v35  ;;  %v2270_v23 = vadd.f32 %v2269_v47, %v2258_v41  ;;  %v2489_v20 = vmul.f32 %v4787_v50, %v2094_v42  ;;  %v2499_v36 = vadd.f32 %v4272_v15, %v2488_v24  ;;  %v4379_v15 = vld [vmem:[#allocation3 + $0x10] sm:$0xff] }
 0x224   :  { %v2365_v6 = vadd.f32 %v2364_v45, %v2354_v43  ;;  %v2372_v54 = vadd.f32 %v2371_v10, %v2360_v30  ;;  %v2429_v44 = vadd.f32 %v2428_v56, %v2418_v28  ;;  %v2436_v3 = vadd.f32 %v2435_v37, %v2424_v38  ;;  %v4381_v10 = vld [vmem:[#allocation3 + $0x40] sm:$0xff]  ;;  %v4387_v28 = vld [vmem:[#allocation3 + $0x58] sm:$0xff] }
 0x225   :  { %v2500_v52 = vadd.f32 %v2499_v36, %v2489_v20  ;;  %v2506_v55 = vadd.f32 %v4286_v53, %v2494_v16  ;;  %v4788_v21 = vunpack.c.h.bf16 %v4301_v49  ;;  %v2570_v34 = vadd.f32 %v4291_v39, %v2559_v60  ;;  %v4383_v36 = vld [vmem:[#allocation3 + $0xa0] sm:$0xff]  ;;  %v4385_v53 = vld [vmem:[#allocation3 + $0x28] sm:$0xff] }
 0x226   :  { %v2577_v35 = vadd.f32 %v4293_v12, %v2565_v58  ;;  %4789 = vst [vmem:[#allocation26_spill] sm:$0xff] %v4383_v36  ;;  %v4741_v39 = vunpack.c.l.bf16 %v4379_v15  ;;  %v4744_v12 = vunpack.c.h.bf16 %v4379_v15  ;;  %v4742_v38 = vunpack.c.l.bf16 %v4381_v10  ;;  %v4397_v58 = vld [vmem:[#allocation3 + $0xe8] sm:$0xff] }
 0x227   :  { %v2560_v22 = vmul.f32 %v4788_v21, %v2094_v42  ;;  %v4373_v47 = vadd.f32 %v2506_v55, %v2495_v27  ;;  %v4395_v27 = vld [vmem:[#allocation3 + $0xd0] sm:$0xff]  ;;  %v4753_v41 = vunpack.c.l.bf16 %v4385_v53  ;;  %v4756_v19 = vunpack.c.h.bf16 %v4385_v53 }
 0x228   :  { %v4377_v50 = vadd.f32 %v2577_v35, %v2566_v48  ;;  %v4743_v48 = vunpack.c.l.bf16 %v4383_v36  ;;  %v4745_v56 = vunpack.c.h.bf16 %v4381_v10  ;;  %v4750_v37 = vunpack.c.h.bf16 %v4383_v36 }
 0x229   :  { %v4375_v59 = vadd.f32 %v2570_v34, %v2560_v22  ;;  %v4754_v20 = vunpack.c.l.bf16 %v4387_v28  ;;  %v4758_v30 = vunpack.c.h.bf16 %v4387_v28 }
 0x25d   :  { %v2221_v46 = vpop.f32.mrb[4].mxu0 }
 0x25e   :  { %v2223_v16 = vpop.f32.mrb[5].mxu0  ;;  %v2253_v45 = vmul.f32 %v4741_v39, %v2221_v46  ;;  %v2355_v55 = vmul.f32 %v4742_v38, %v2221_v46  ;;  %v2419_v21 = vmul.f32 %v4083_v25, %v2221_v46  ;;  %v2490_v22 = vmul.f32 %v4743_v48, %v2221_v46 }
 0x25f   :  { %v2225_v34 = vpop.f32.mrb[6].mxu0  ;;  %v2254_v35 = vmul.f32 %v4744_v12, %v2223_v16  ;;  %v2356_v42 = vmul.f32 %v4745_v56, %v2223_v16  ;;  %v2420_v60 = vmul.f32 %v4089_v29, %v2223_v16  ;;  %v2491_v39 = vmul.f32 %v4750_v37, %v2223_v16 }
 0x260   :  { %v2227_v24 = vpop.f32.mrb[7].mxu0  ;;  %v2264_v33 = vadd.f32 %v2263_v7, %v2253_v45  ;;  %v2259_v38 = vmul.f32 %v4753_v41, %v2225_v34  ;;  %v2366_v43 = vadd.f32 %v2365_v6, %v2355_v55  ;;  %v2361_v48 = vmul.f32 %v4754_v20, %v2225_v34 }
 0x261   :  { %v2260_v12 = vmul.f32 %v4756_v19, %v2227_v24  ;;  %v2362_v56 = vmul.f32 %v4758_v30, %v2227_v24  ;;  %v2430_v40 = vadd.f32 %v2429_v44, %v2419_v21  ;;  %v2425_v49 = vmul.f32 %v4091_v31, %v2225_v34 }
 0x262   :  { %v2265_v36 = vadd.f32 %v2264_v33, %v2254_v35  ;;  %v2271_v37 = vadd.f32 %v2270_v23, %v2259_v38  ;;  %v2367_v26 = vadd.f32 %v2366_v43, %v2356_v42  ;;  %v2373_v7 = vadd.f32 %v2372_v54, %v2361_v48 }
 0x263   :  { %v2431_v45 = vadd.f32 %v2430_v40, %v2420_v60  ;;  %v2426_v41 = vmul.f32 %v4101_v11, %v2227_v24  ;;  %v2437_v6 = vadd.f32 %v2436_v3, %v2425_v49  ;;  %v2501_v55 = vadd.f32 %v2500_v52, %v2490_v22 }
 0x264   :  { %2266 = vadd.xlane.f32.xlu0 %v2265_v36  ;;  %v2272_v20 = vadd.f32 %v2271_v37, %v2260_v12  ;;  %v2374_v29 = vadd.f32 %v2373_v7, %v2362_v56  ;;  %v4790_v19 = vunpack.c.l.bf16 %v4389_v9  ;;  %v4791_v30 = vunpack.c.h.bf16 %v4389_v9 }
 0x265   :  { %v2438_v21 = vadd.f32 %v2437_v6, %v2426_v41  ;;  %v2502_v31 = vadd.f32 %v2501_v55, %v2491_v39  ;;  %v4792_v23 = vunpack.c.l.bf16 %v4395_v27  ;;  %v4793_v54 = vunpack.c.h.bf16 %v4395_v27 }
 0x266   :  { %v2496_v25 = vmul.f32 %v4790_v19, %v2225_v34  ;;  %v2497_v44 = vmul.f32 %v4791_v30, %v2227_v24  ;;  %2273 = vadd.xlane.f32.xlu1 %v2272_v20  ;;  %v4794_v3 = vunpack.c.l.bf16 %v4397_v58  ;;  %v4795_v36 = vunpack.c.h.bf16 %v4397_v58 }
 0x267   :  { %v2561_v38 = vmul.f32 %v4792_v23, %v2221_v46  ;;  %v2562_v48 = vmul.f32 %v4793_v54, %v2223_v16 }
 0x268   :  { %v2508_v49 = vadd.f32 %v4373_v47, %v2496_v25  ;;  %v2567_v52 = vmul.f32 %v4794_v3, %v2225_v34  ;;  %v2568_v12 = vmul.f32 %v4795_v36, %v2227_v24  ;;  %2368 = vadd.xlane.f32.xlu0 %v2367_v26  ;;  %v2683_v25 = vpop.xlane.xlu0 %2682  ;;  %v2750_v47 = vpop.xlane.xlu1 %2749 }
 0x269   :  { %v2572_v19 = vadd.f32 %v4375_v59, %v2561_v38 }
 0x26a   :  { %v2509_v41 = vadd.f32 %v2508_v49, %v2497_v44  ;;  %v2579_v39 = vadd.f32 %v4377_v50, %v2567_v52  ;;  %2375 = vadd.xlane.f32.xlu1 %v2374_v29  ;;  %v2629_v50 = vld [vmem:[%s4691_s2] sm:$0xff] }
 0x26b   :  { %v2573_v56 = vadd.f32 %v2572_v19, %v2562_v48  ;;  %vm2691_vm0 = vcmp.eq.s32.totalorder %v2629_v50, 0  ;;  %vm2758_vm1 = vcmp.eq.s32.totalorder %v2629_v50, 1  ;;  %vm2825_vm4 = vcmp.eq.s32.totalorder %v2629_v50, 2 }
 0x26c   :  { %v2580_v37 = vadd.f32 %v2579_v39, %v2568_v12  ;;  %2432 = vadd.xlane.f32.xlu0 %v2431_v45  ;;  %v2690_v20 = vpop.xlane.xlu0 %2689  ;;  %v2757_v30 = vpop.xlane.xlu1 %2756  ;;  %v2693_v24 = vsel %vm2691_vm0, %v2683_v25, 0.0  ;;  %v2760_v42 = vsel %vm2758_vm1, %v2750_v47, 0.0  ;;  %vm2892_vm6 = vcmp.eq.s32.totalorder %v2629_v50, 3 }
 0x26d   :  { %v2762_v34 = vadd.f32 %v2760_v42, %v2693_v24  ;;  %vm2959_vm8 = vcmp.eq.s32.totalorder %v2629_v50, 4  ;;  %vm3020_vm1 = vcmask 48128  }
 0x26e   :  { %2439 = vadd.xlane.f32.xlu1 %v2438_v21 }
 0x270   :  { %2503 = vadd.xlane.f32.xlu0 %v2502_v31  ;;  %v2817_v40 = vpop.xlane.xlu0 %2816  ;;  %v2824_v43 = vpop.xlane.xlu1 %2823  ;;  %v2630_v31 = vld [vmem:[%s4691_s2 + $0x8] sm:$0xff] }
 0x271   :  { %vm2692_vm2 = vcmp.eq.s32.totalorder %v2630_v31, 0  ;;  %vm2759_vm3 = vcmp.eq.s32.totalorder %v2630_v31, 1  ;;  %vm2826_vm5 = vcmp.eq.s32.totalorder %v2630_v31, 2  ;;  %v2827_v7 = vsel %vm2825_vm4, %v2817_v40, 0.0 }
 0x272   :  { %2510 = vadd.xlane.f32.xlu1 %v2509_v41  ;;  %v2694_v16 = vsel %vm2692_vm2, %v2690_v20, 0.0  ;;  %v2761_v22 = vsel %vm2759_vm3, %v2757_v30, 0.0  ;;  %v2828_v55 = vsel %vm2826_vm5, %v2824_v43, 0.0  ;;  %v2829_v44 = vadd.f32 %v2827_v7, %v2762_v34  ;;  %v2969_v20 = vld [vmem:[%s4690_s1] sm:$0xff] }
 0x273   :  { %v2763_v45 = vadd.f32 %v2761_v22, %v2694_v16  ;;  %vm2893_vm7 = vcmp.eq.s32.totalorder %v2630_v31, 3  ;;  %vm2960_vm10 = vcmp.eq.s32.totalorder %v2630_v31, 4  ;;  %vm2971_vm14 = vcmp.eq.f32.partialorder %v2969_v20, 0.0  ;;  %v2230_v34 = vld [vmem:[#allocation8] sm:$0x3f] }
 0x274   :  { %2574 = vadd.xlane.f32.xlu0 %v2573_v56  ;;  %v2884_v59 = vpop.xlane.xlu0 %2883  ;;  %v2891_v26 = vpop.xlane.xlu1 %2890  ;;  %v4482_v7 = vrot.slane %v2230_v34, %v4138_v61  ;;  %v4799_v61 = vunpack.c.l.bf16 %v4295_v18 }
 0x275   :  { %v2894_v23 = vsel %vm2892_vm6, %v2884_v59, 0.0  ;;  %v2830_v38 = vadd.f32 %v2828_v55, %v2763_v45  ;;  %v2895_v48 = vsel %vm2893_vm7, %v2891_v26, 0.0  ;;  %v4485_v45 = vrot.slane %v2230_v34, %v4140_v0  ;;  %v4800_v0 = vld [vmem:[#allocation14_spill] sm:$0xff] }
 0x276   :  { %2581 = vadd.xlane.f32.xlu1 %v2580_v37  ;;  %v2896_v49 = vadd.f32 %v2894_v23, %v2829_v44  ;;  %v4491_v55 = vrot.slane %v2230_v34, %v4146_v8  ;;  %v4796_v44 = vld [vmem:[#allocation13_spill] sm:$0xff] }
 0x277   :  { %v2897_v36 = vadd.f32 %v2895_v48, %v2830_v38  ;;  %v4798_v38 = vunpack.c.h.bf16 %v4796_v44  ;;  %v4801_v48 = vunpack.c.l.bf16 %v4800_v0 }
 0x278   :  { %v2951_v29 = vpop.xlane.xlu0 %2950  ;;  %v2958_v46 = vpop.xlane.xlu1 %2957 }
 0x279   :  { %v2961_v52 = vsel %vm2959_vm8, %v2951_v29, 0.0  ;;  %v2962_v41 = vsel %vm2960_vm10, %v2958_v46, 0.0  ;;  %v2970_v29 = vld [vmem:[%s4690_s1 + $0x8] sm:$0xff]  ;;  %s3907_s1 = smov 1  }
 0x27a   :  { %v2963_v56 = vadd.f32 %v2961_v52, %v2896_v49  ;;  %v2964_v43 = vadd.f32 %v2962_v41, %v2897_v36  ;;  %vm2972_vm0 = vcmp.eq.f32.partialorder %v2970_v29, 0.0  ;;  %v4802_v49 = vunpack.c.h.bf16 %v4800_v0 }
 0x27b   :  { %v4803_v52 = vunpack.c.h.bf16 %v4295_v18 }
 0x27c   :  { %v2313_v8 = vmul.f32 %v4482_v7, %v4802_v49 }
 0x2f1   :  { %v2267_v33 = vpop.xlane.xlu0 %2266 }
 0x2f3   :  { %v2274_v60 = vpop.xlane.xlu1 %2273 }
 0x2f5   :  { %v2369_v35 = vpop.xlane.xlu0 %2368 }
 0x2f6   :  { %v2610_v12 = vsel %vm2609_vm9, %v2267_v33, %v2369_v35  ;;  %v4479_v35 = vrot.slane %v2230_v34, %v4136_v57  ;;  %v2307_v57 = vmul.f32 %v4482_v7, %v4798_v38 }
 0x2f7   :  { %v2376_v6 = vpop.xlane.xlu1 %2375 }
 0x2f8   :  { %v2611_v37 = vsel %vm2609_vm9, %v2274_v60, %v2376_v6  ;;  %v4488_v6 = vrot.slane %v2230_v34, %v4142_v4  ;;  %v2312_v4 = vmul.f32 %v4479_v35, %v4801_v48  ;;  %v4819_v48 = vunpack.c.l.bf16 %v4381_v10 }
 0x2f9   :  { %v2433_v21 = vpop.xlane.xlu0 %2432 }
 0x2fa   :  { %v2613_v39 = vsel %vm2612_vm11, %v2610_v12, %v2433_v21  ;;  %v4797_v21 = vunpack.c.l.bf16 %v4796_v44  ;;  %v2309_v36 = vmul.f32 %v4488_v6, %v4803_v52 }
 0x2fb   :  { %v2440_v54 = vpop.xlane.xlu1 %2439 }
 0x2fc   :  { %v2614_v30 = vsel %vm2612_vm11, %v2611_v37, %v2440_v54  ;;  %v2306_v23 = vmul.f32 %v4479_v35, %v4797_v21  ;;  %v2308_v54 = vmul.f32 %v4485_v45, %v4799_v61  ;;  %v2325_v37 = vadd.f32 %v2313_v8, %v2312_v4 }
 0x2fd   :  { %v2504_v3 = vpop.xlane.xlu0 %2503  ;;  %v4820_v8 = vunpack.c.h.bf16 %v4305_v32 }
 0x2fe   :  { %v2616_v25 = vsel %vm2615_vm12, %v2613_v39, %v2504_v3  ;;  %v4509_v3 = vrot.slane %v2230_v34, %v4148_v13  ;;  %v2318_v12 = vadd.f32 %v2307_v57, %v2306_v23  ;;  %v4805_v39 = vunpack.c.h.bf16 %v4303_v51 }
 0x2ff   :  { %v2511_v19 = vpop.xlane.xlu1 %2510  ;;  %v4815_v34 = vunpack.c.h.bf16 %v4379_v15  ;;  %v4817_v57 = vunpack.c.l.bf16 %v4305_v32  ;;  %v2386_v52 = vmul.f32 %v4820_v8, %v4488_v6 }
 0x300   :  { %v2617_v59 = vsel %vm2615_vm12, %v2614_v30, %v2511_v19  ;;  %v4804_v19 = vunpack.c.l.bf16 %v4303_v51  ;;  %v4809_v30 = vunpack.c.l.bf16 %v4379_v15  ;;  %v2381_v15 = vmul.f32 %v4819_v48, %v4491_v55 }
 0x301   :  { %v2575_v47 = vpop.xlane.xlu0 %2574  ;;  %v2311_v44 = vmul.f32 %v4509_v3, %v4815_v34  ;;  %v2385_v61 = vmul.f32 %v4817_v57, %v4485_v45  ;;  %v4829_v34 = vld [vmem:[#allocation20_spill] sm:$0xff]  ;;  %v4832_v57 = vld [vmem:[#allocation27_spill] sm:$0xff] }
 0x302   :  { %v2619_v40 = vsel %vm2618_vm13, %v2616_v25, %v2575_v47  ;;  %v2314_v41 = vmul.f32 %v4485_v45, %v4804_v19  ;;  %v4806_v25 = vld [vmem:[#allocation15_spill] sm:$0xff]  ;;  %v4821_v19 = vunpack.c.h.bf16 %v4381_v10  ;;  %v2442_v10 = vmul.f32 %v4055_v63, %v4482_v7  ;;  %v4825_v63 = vld [vmem:[#allocation17_spill] sm:$0xff] }
 0x303   :  { %v2965_v26 = vadd.f32 %v2963_v56, %v2619_v40  ;;  %v2582_v50 = vpop.xlane.xlu1 %2581  ;;  %v2315_v56 = vmul.f32 %v4488_v6, %v4805_v39  ;;  %v4807_v47 = vunpack.c.l.bf16 %v4806_v25  ;;  %v4808_v13 = vunpack.c.h.bf16 %v4806_v25 }
 0x304   :  { %v2620_v31 = vsel %vm2618_vm13, %v2617_v59, %v2582_v50  ;;  %v2310_v40 = vmul.f32 %v4491_v55, %v4809_v30  ;;  %v4810_v59 = vunpack.c.l.bf16 %v4385_v53  ;;  %v2326_v29 = vadd.f32 %v2325_v37, %v2314_v41 }
 0x305   :  { %v2967_v46 = vmul.f32 0.03608439, %v2965_v26  ;;  %v2966_v33 = vadd.f32 %v2964_v43, %v2620_v31  ;;  %v2377_v20 = vmul.f32 %v4807_v47, %v4479_v35  ;;  %v2378_v18 = vmul.f32 %v4808_v13, %v4482_v7 }
 0x306   :  { %v2319_v43 = vadd.f32 %v2318_v12, %v2308_v54  ;;  %v2316_v51 = vmul.f32 %v4491_v55, %v4810_v59  ;;  %v4811_v26 = vunpack.c.l.bf16 %v4297_v14  ;;  %v4812_v31 = vunpack.c.h.bf16 %v4297_v14 }
 0x307   :  { %v2968_v24 = vmul.f32 0.03608439, %v2966_v33  ;;  %v4470_v42 = vsel %vm2971_vm14, -1e+09, %v2967_v46  ;;  %v2389_v33 = vadd.f32 %v2378_v18, %v2377_v20  ;;  %v4818_v14 = vunpack.c.h.bf16 %v4385_v53 }
 0x308   :  { %v2976_v60 = vsel %vm2975_vm15, %v4470_v42, -inf  ;;  %v2379_v50 = vmul.f32 %v4811_v26, %v4485_v45  ;;  %v2380_v46 = vmul.f32 %v4812_v31, %v4488_v6  ;;  %v2320_v21 = vadd.f32 %v2319_v43, %v2309_v36 }
 0x309   :  { %2977 = vmax.xlane.f32.xlu0 %v2976_v60  ;;  %v4474_v16 = vsel %vm2972_vm0, -1e+09, %v2968_v24  ;;  %v4813_v24 = vld [vmem:[#allocation16_spill] sm:$0xff]  ;;  %v2317_v54 = vmul.f32 %v4509_v3, %v4818_v14  ;;  %v2327_v0 = vadd.f32 %v2326_v29, %v2315_v56  ;;  %v2382_v41 = vmul.f32 %v4821_v19, %v4509_v3 }
 0x30a   :  { %v2979_v22 = vsel %vm2975_vm15, %v4474_v16, -inf  ;;  %v4814_v60 = vunpack.c.l.bf16 %v4813_v24  ;;  %v4816_v23 = vunpack.c.h.bf16 %v4813_v24  ;;  %v2390_v4 = vadd.f32 %v2389_v33, %v2379_v50 }
 0x30b   :  { %2980 = vmax.xlane.f32.xlu1 %v2979_v22  ;;  %v2321_v49 = vadd.f32 %v2320_v21, %v2310_v40  ;;  %v2328_v12 = vadd.f32 %v2327_v0, %v2316_v51  ;;  %v4822_v56 = vunpack.c.l.bf16 %v4387_v28  ;;  %v4823_v13 = vunpack.c.h.bf16 %v4387_v28 }
 0x30c   :  { %v2383_v22 = vmul.f32 %v4814_v60, %v4479_v35  ;;  %v2384_v38 = vmul.f32 %v4816_v23, %v4482_v7  ;;  %v2391_v53 = vadd.f32 %v2390_v4, %v2380_v46  ;;  %v2441_v30 = vmul.f32 %v4053_v62, %v4479_v35  ;;  %v4824_v62 = vld [vmem:[#allocation19_spill] sm:$0xff]  ;;  %v4827_v60 = vld [vmem:[#allocation22_spill] sm:$0xff] }
 0x30d   :  { %v2322_v39 = vadd.f32 %v2321_v49, %v2311_v44  ;;  %v2387_v37 = vmul.f32 %v4822_v56, %v4491_v55  ;;  %v2329_v47 = vadd.f32 %v2328_v12, %v2317_v54  ;;  %v2388_v32 = vmul.f32 %v4823_v13, %v4509_v3  ;;  %v4830_v44 = vld [vmem:[#allocation21_spill] sm:$0xff] }
 0x30e   :  { %v2396_v36 = vadd.f32 %v2384_v38, %v2383_v22  ;;  %v2392_v20 = vadd.f32 %v2391_v53, %v2381_v15  ;;  %v2443_v40 = vmul.f32 %v4063_v17, %v4485_v45  ;;  %v2444_v59 = vmul.f32 %v4065_v5, %v4488_v6  ;;  %v4826_v17 = vld [vmem:[#allocation18_spill] sm:$0xff]  ;;  %v4834_v15 = vld [vmem:[#allocation23_spill] sm:$0xff] }
 0x30f   :  { %2323 = vadd.xlane.f32.xlu0 %v2322_v39  ;;  %2330 = vadd.xlane.f32.xlu1 %v2329_v47  ;;  %v2453_v26 = vadd.f32 %v2442_v10, %v2441_v30  ;;  %v2447_v28 = vmul.f32 %v4057_v1, %v4479_v35  ;;  %v2448_v50 = vmul.f32 %v4059_v2, %v4482_v7  ;;  %v4828_v22 = vunpack.c.l.bf16 %v4827_v60  ;;  %v4843_v30 = vld [vmem:[#allocation24_spill] sm:$0xff] }
 0x310   :  { %v2397_v25 = vadd.f32 %v2396_v36, %v2385_v61  ;;  %v2393_v43 = vadd.f32 %v2392_v20, %v2382_v41  ;;  %v2445_v29 = vmul.f32 %v4824_v62, %v4491_v55  ;;  %v2449_v31 = vmul.f32 %v4825_v63, %v4485_v45  ;;  %v4838_v41 = vld [vmem:[#allocation29_spill] sm:$0xff]  ;;  %v4847_v62 = vld [vmem:[#allocation28_spill] sm:$0xff] }
 0x311   :  { %v2450_v46 = vmul.f32 %v4826_v17, %v4488_v6  ;;  %v2454_v5 = vadd.f32 %v2453_v26, %v2443_v40  ;;  %v2460_v24 = vadd.f32 %v2448_v50, %v2447_v28  ;;  %v2512_v1 = vmul.f32 %v4828_v22, %v4479_v35 }
 0x312   :  { %v2398_v18 = vadd.f32 %v2397_v25, %v2386_v52  ;;  %v2446_v2 = vmul.f32 %v4829_v34, %v4509_v3  ;;  %v2451_v21 = vmul.f32 %v4830_v44, %v4491_v55  ;;  %v4831_v23 = vunpack.c.h.bf16 %v4827_v60 }
 0x313   :  { %2394 = vadd.xlane.f32.xlu0 %v2393_v43  ;;  %v4833_v61 = vunpack.c.l.bf16 %v4832_v57  ;;  %v2455_v54 = vadd.f32 %v2454_v5, %v2444_v59  ;;  %v2452_v0 = vmul.f32 %v4101_v11, %v4509_v3  ;;  %v2461_v48 = vadd.f32 %v2460_v24, %v2449_v31 }
 0x314   :  { %v2399_v51 = vadd.f32 %v2398_v18, %v2387_v37  ;;  %v2513_v38 = vmul.f32 %v4831_v23, %v4482_v7  ;;  %v4835_v4 = vunpack.c.l.bf16 %v4834_v15  ;;  %v4836_v8 = vunpack.c.h.bf16 %v4832_v57  ;;  %v4840_v37 = vld [vmem:[#allocation26_spill] sm:$0xff] }
 0x315   :  { %v2514_v14 = vmul.f32 %v4833_v61, %v4485_v45  ;;  %v4837_v12 = vunpack.c.h.bf16 %v4834_v15  ;;  %v4839_v53 = vunpack.c.l.bf16 %v4838_v41  ;;  %v2456_v56 = vadd.f32 %v2455_v54, %v2445_v29 }
 0x316   :  { %v2400_v33 = vadd.f32 %v2399_v51, %v2388_v32  ;;  %v2518_v49 = vmul.f32 %v4835_v4, %v4479_v35  ;;  %v2515_v52 = vmul.f32 %v4836_v8, %v4488_v6  ;;  %v2524_v36 = vadd.f32 %v2513_v38, %v2512_v1  ;;  %v4851_v1 = vld [vmem:[#allocation25_spill] sm:$0xff] }
 0x317   :  { %v2519_v19 = vmul.f32 %v4837_v12, %v4482_v7  ;;  %v2520_v39 = vmul.f32 %v4839_v53, %v4485_v45  ;;  %v2462_v11 = vadd.f32 %v2461_v48, %v2450_v46  ;;  %v4841_v25 = vunpack.c.l.bf16 %v4840_v37 }
 0x318   :  { %2401 = vadd.xlane.f32.xlu1 %v2400_v33  ;;  %v4842_v20 = vunpack.c.h.bf16 %v4838_v41  ;;  %v2525_v32 = vadd.f32 %v2524_v36, %v2514_v14  ;;  %v4844_v10 = vunpack.c.l.bf16 %v4843_v30  ;;  %v4845_v43 = vunpack.c.h.bf16 %v4843_v30  ;;  %v4855_v14 = vld [vmem:[#allocation30_spill] sm:$0xff] }
 0x319   :  { %v2516_v47 = vmul.f32 %v4841_v25, %v4491_v55  ;;  %v2531_v18 = vadd.f32 %v2519_v19, %v2518_v49  ;;  %v2457_v51 = vadd.f32 %v2456_v56, %v2446_v2  ;;  %v2463_v26 = vadd.f32 %v2462_v11, %v2451_v21 }
 0x31a   :  { %v2521_v13 = vmul.f32 %v4842_v20, %v4488_v6  ;;  %v2583_v40 = vmul.f32 %v4844_v10, %v4479_v35  ;;  %v2584_v59 = vmul.f32 %v4845_v43, %v4482_v7  ;;  %v4846_v28 = vunpack.c.h.bf16 %v4840_v37 }
 0x31b   :  { %v4848_v29 = vunpack.c.l.bf16 %v4847_v62  ;;  %v2526_v31 = vadd.f32 %v2525_v32, %v2515_v52  ;;  %v4849_v17 = vunpack.c.l.bf16 %v4389_v9  ;;  %v2532_v33 = vadd.f32 %v2531_v18, %v2520_v39 }
 0x31c   :  { %v2517_v50 = vmul.f32 %v4846_v28, %v4509_v3  ;;  %v4850_v5 = vunpack.c.h.bf16 %v4847_v62  ;;  %v2464_v60 = vadd.f32 %v2463_v26, %v2452_v0  ;;  %v2595_v22 = vadd.f32 %v2584_v59, %v2583_v40 }
 0x31d   :  { %v2585_v63 = vmul.f32 %v4848_v29, %v4485_v45  ;;  %v2522_v46 = vmul.f32 %v4849_v17, %v4491_v55  ;;  %v4852_v34 = vunpack.c.l.bf16 %v4851_v1  ;;  %v4853_v44 = vunpack.c.h.bf16 %v4851_v1 }
 0x31e   :  { %v2586_v24 = vmul.f32 %v4850_v5, %v4488_v6  ;;  %v2527_v23 = vadd.f32 %v2526_v31, %v2516_v47  ;;  %v4854_v38 = vunpack.c.h.bf16 %v4389_v9  ;;  %v2533_v61 = vadd.f32 %v2532_v33, %v2521_v13 }
 0x31f   :  { %v2589_v2 = vmul.f32 %v4852_v34, %v4479_v35  ;;  %v2590_v21 = vmul.f32 %v4853_v44, %v4482_v7  ;;  %v4856_v54 = vunpack.c.l.bf16 %v4855_v14  ;;  %v4857_v0 = vunpack.c.l.bf16 %v4395_v27 }
 0x320   :  { %v2523_v57 = vmul.f32 %v4854_v38, %v4509_v3  ;;  %v2596_v4 = vadd.f32 %v2595_v22, %v2585_v63  ;;  %v4858_v35 = vunpack.c.h.bf16 %v4855_v14  ;;  %v2528_v8 = vadd.f32 %v2527_v23, %v2517_v50 }
 0x321   :  { %v2591_v48 = vmul.f32 %v4856_v54, %v4485_v45  ;;  %v2587_v15 = vmul.f32 %v4857_v0, %v4491_v55  ;;  %v2602_v7 = vadd.f32 %v2590_v21, %v2589_v2  ;;  %v2534_v52 = vadd.f32 %v2533_v61, %v2522_v46 }
 0x322   :  { %v2592_v49 = vmul.f32 %v4858_v35, %v4488_v6  ;;  %v4859_v9 = vunpack.c.h.bf16 %v4395_v27  ;;  %v2597_v12 = vadd.f32 %v2596_v4, %v2586_v24  ;;  %v4860_v45 = vunpack.c.l.bf16 %v4397_v58 }
 0x323   :  { %v2603_v41 = vadd.f32 %v2602_v7, %v2591_v48  ;;  %v2535_v53 = vadd.f32 %v2534_v52, %v2523_v57  ;;  %v4861_v56 = vunpack.c.h.bf16 %v4397_v58  ;;  %v3007_v61 = vstv %s4695_s6 }
 0x324   :  { %v2588_v36 = vmul.f32 %v4859_v9, %v4509_v3  ;;  %v2593_v19 = vmul.f32 %v4860_v45, %v4491_v55  ;;  %v2598_v39 = vadd.f32 %v2597_v12, %v2587_v15 }
 0x325   :  { %v2594_v11 = vmul.f32 %v4861_v56, %v4509_v3  ;;  %v2604_v6 = vadd.f32 %v2603_v41, %v2592_v49 }
 0x326   :  { %v2599_v37 = vadd.f32 %v2598_v39, %v2588_v36 }
 0x327   :  { %v2605_v25 = vadd.f32 %v2604_v6, %v2593_v19 }
 0x329   :  { %v2606_v47 = vadd.f32 %v2605_v25, %v2594_v11 }
 0x396   :  { %v2978_v20 = vpop.xlane.xlu0 %2977 }
 0x397   :  { %v2982_v27 = vsub.f32 %v4470_v42, %v2978_v20 }
 0x398   :  { %v2981_v13 = vpop.xlane.xlu1 %2980 }
 0x399   :  { %v2984_v32 = vmul.f32 1.442695, %v2982_v27  ;;  %v2983_v18 = vsub.f32 %v4474_v16, %v2981_v13 }
 0x39b   :  { %3793 = vpow2.f32 %v2984_v32  ;;  %v2986_v55 = vmul.f32 1.442695, %v2983_v18 }
 0x39c   :  { %v2324_v42 = vpop.xlane.xlu0 %2323  ;;  %v2331_v3 = vpop.xlane.xlu1 %2330 }
 0x39d   :  { %3795 = vpow2.f32 %v2986_v55 }
 0x3a0   :  { %v2395_v16 = vpop.xlane.xlu0 %2394 }
 0x3a1   :  { %v2621_v29 = vsel %vm2609_vm9, %v2324_v42, %v2395_v16 }
 0x3a5   :  { %v3794_v30 = vpop.eup %3793  ;;  %v2402_v43 = vpop.xlane.xlu1 %2401 }
 0x3a6   :  { %v2988_v10 = vsel %vm2975_vm15, %v3794_v30, 0.0  ;;  %v2622_v17 = vsel %vm2609_vm9, %v2331_v3, %v2402_v43 }
 0x3a7   :  { %v3796_v40 = vpop.eup %3795  ;;  %2989 = vadd.xlane.f32.xlu0 %v2988_v10 }
 0x3a8   :  { %v2991_v58 = vsel %vm2975_vm15, %v3796_v40, 0.0 }
 0x3a9   :  { %2992 = vadd.xlane.f32.xlu1 %v2991_v58 }
 0x3ab   :  { %2458 = vadd.xlane.f32.xlu0 %v2457_v51 }
 0x3ad   :  { %2465 = vadd.xlane.f32.xlu1 %v2464_v60 }
 0x3af   :  { %2529 = vadd.xlane.f32.xlu0 %v2528_v8 }
 0x3b1   :  { %2536 = vadd.xlane.f32.xlu1 %v2535_v53 }
 0x3b3   :  { %2600 = vadd.xlane.f32.xlu0 %v2599_v37 }
 0x3b5   :  { %2607 = vadd.xlane.f32.xlu1 %v2606_v47 }
 0x434   :  { %v2990_v59 = vpop.xlane.xlu0 %2989 }
 0x435   :  { %3797 = vrcp.f32 %v2990_v59 }
 0x436   :  { %v2993_v26 = vpop.xlane.xlu1 %2992 }
 0x437   :  { %3799 = vrcp.f32 %v2993_v26 }
 0x438   :  { %v2459_v28 = vpop.xlane.xlu0 %2458 }
 0x439   :  { %v2623_v31 = vsel %vm2612_vm11, %v2621_v29, %v2459_v28 }
 0x43a   :  { %v2466_v50 = vpop.xlane.xlu1 %2465 }
 0x43b   :  { %v2624_v60 = vsel %vm2612_vm11, %v2622_v17, %v2466_v50 }
 0x43c   :  { %v2530_v62 = vpop.xlane.xlu0 %2529 }
 0x43d   :  { %v2625_v46 = vsel %vm2615_vm12, %v2623_v31, %v2530_v62 }
 0x43e   :  { %v2537_v63 = vpop.xlane.xlu1 %2536 }
 0x43f   :  { %v3798_v51 = vpop.eup %3797  ;;  %v2626_v1 = vsel %vm2615_vm12, %v2624_v60, %v2537_v63 }
 0x440   :  { %v2601_v33 = vpop.xlane.xlu0 %2600  ;;  %v2995_v5 = vmul.f32 %v3798_v51, %v3794_v30 }
 0x441   :  { %v3800_v24 = vpop.eup %3799  ;;  %v2627_v22 = vsel %vm2618_vm13, %v2625_v46, %v2601_v33 }
 0x442   :  { %v2608_v34 = vpop.xlane.xlu1 %2607  ;;  %v2998_v2 = vmul.f32 %v2995_v5, %v2627_v22  ;;  %v2997_v44 = vmul.f32 %v3800_v24, %v3796_v40 }
 0x443   :  { %v2628_v21 = vsel %vm2618_vm13, %v2626_v1, %v2608_v34 }
 0x444   :  { %v3000_v23 = vsel %vm2975_vm15, %v2998_v2, 0.0  ;;  %v2999_v38 = vmul.f32 %v2997_v44, %v2628_v21 }
 0x445   :  { %3001 = vadd.xlane.f32.xlu0 %v3000_v23 }
 0x446   :  { %v3003_v57 = vsel %vm2975_vm15, %v2999_v38, 0.0 }
 0x447   :  { %3004 = vadd.xlane.f32.xlu1 %v3003_v57 }
 0x458   :  { %3014 = vrot.lane.b32.xlu1 %v2997_v44, %s3907_s1 }
 0x45b   :  { %3012 = vrot.lane.b32.xlu0 %v2995_v5, %s3907_s1 }
 0x4d2   :  { %v3002_v14 = vpop.xlane.xlu0 %3001 }
 0x4d3   :  { %v3008_v48 = vadd.f32 %v3007_v61, %v3002_v14 }
 0x4d4   :  { %v3005_v54 = vpop.xlane.xlu1 %3004 }
 0x4d5   :  { %v3009_v15 = vadd.f32 %v3007_v61, %v3005_v54 }
 0x4d6   :  { %v3013_v0 = vpop.permute.xlu0 %3012 }
 0x4d7   :  { %v3018_v4 = vsel %vm2609_vm9, %v3008_v48, %v3013_v0 }
 0x4d8   :  { %3021 = vst.msk [vmem:[%s4696_s7] sm:$0xff] %vm3020_vm1, %v3018_v4  ;;  %v3015_v35 = vpop.permute.xlu1 %3014 }
 0x4d9   :  { %v3019_v49 = vsel %vm2609_vm9, %v3009_v15, %v3015_v35 }
 0x4da   :  { %3022 = vst.msk [vmem:[%s4696_s7 + $0x8] sm:$0xff] %vm3020_vm1, %v3019_v49 }
 0x4db   :  { %3027 = vsyncpa [#allocation4], 1 }
 0x4dc   :  { %3028 = vsyncpa [#allocation6], 1 }
 0x4dd   :  { %3029 = vsyncpa [#allocation9], 1 }

</bundles_post_ra>
